<compile_context>
chip_gen: v7x
topology: tpu7x:2x2x1
jax: 0.10.0
libtpu: 0.0.40
codegen_flags: <defaults>
</compile_context>

<pallas_src>
import functools
import math

import jax
import jax.numpy as jnp
from jax import lax
from jax.experimental import pallas as pl
from jax.experimental.pallas import tpu as pltpu

LN_EPS = 1e-6  # torchvision ViT: partial(nn.LayerNorm, eps=1e-6)


def _layernorm(y, g, b):
    mean = jnp.mean(y, axis=-1, keepdims=True)
    var = jnp.mean((y - mean) ** 2, axis=-1, keepdims=True)
    return (y - mean) * lax.rsqrt(var + LN_EPS) * g + b


def _erf(x):
    # Abramowitz & Stegun 7.1.26, |err| < 1.5e-7 (VPU/EUP-friendly ops only).
    a1, a2, a3, a4, a5 = 0.254829592, -0.284496736, 1.421413741, -1.453152027, 1.061405429
    p = 0.3275911
    ax = jnp.abs(x)
    t = 1.0 / (1.0 + p * ax)
    poly = ((((a5 * t + a4) * t + a3) * t + a2) * t + a1) * t
    y = 1.0 - poly * jnp.exp(-ax * ax)
    return jnp.where(x >= 0, y, -y)


def _gelu(x):  # exact (erf) GELU, matching nn.GELU default
    return 0.5 * x * (1.0 + _erf(x * 0.7071067811865476))


def vit_cls_kernel(feat_ref,
                   wq_ref, bq_ref, wkv_ref, bkv_ref, wo_ref, bo_ref,
                   ln1g_ref, ln1b_ref, ln2g_ref, ln2b_ref,
                   w1_ref, b1_ref, w2_ref, b2_ref,
                   lnfg_ref, lnfb_ref,
                   out_ref, kv_ref, *, num_heads):
    Bb, S, D = feat_ref.shape
    hd = D // num_heads
    scale = 1.0 / math.sqrt(hd)

    x = feat_ref[...]                                           # (Bb, S, D)

    # ---- LN1 over all tokens (K/V need every row; Q only needs the CLS row) ----
    h = _layernorm(x, ln1g_ref[...], ln1b_ref[...])             # (Bb, S, D)

    # K/V projection for all rows: one full-depth matmul, staged in VMEM scratch.
    kv_ref[...] = (jnp.dot(h.reshape(Bb * S, D), wkv_ref[...],
                           preferred_element_type=jnp.float32)
                   + bkv_ref[...]).reshape(Bb, S, 2 * D)

    # Q only for the CLS row of each batch element; fold 1/sqrt(hd) into q here.
    h_cls = h[:, 0, :]                                          # (Bb, D)
    q = (jnp.dot(h_cls, wq_ref[...], preferred_element_type=jnp.float32)
         + bq_ref[...]) * scale                                 # (Bb, D)

    # ---- per-head attention, CLS query only (single query row -> VPU/XLU path) ----
    head_outs = []
    for hh in range(num_heads):                                 # static unroll
        lo = hh * hd
        q_h = q[:, lo:lo + hd]                                  # (Bb, hd)
        k_h = kv_ref[:, :, lo:lo + hd]                          # (Bb, S, hd)
        v_h = kv_ref[:, :, D + lo:D + lo + hd]                  # (Bb, S, hd)
        s = jnp.sum(q_h[:, None, :] * k_h, axis=-1, keepdims=True)   # (Bb, S, 1)
        s = s - jnp.max(s, axis=1, keepdims=True)
        p = jnp.exp(s)
        p = p * pl.reciprocal(jnp.sum(p, axis=1, keepdims=True))
        head_outs.append(jnp.sum(p * v_h, axis=1))              # (Bb, hd)
    o = jnp.concatenate(head_outs, axis=-1)                     # (Bb, D)

    # Out-projection as ONE full-depth matmul; residual-1 on the CLS row only.
    x_cls = x[:, 0, :]                                          # (Bb, D)
    x1 = x_cls + jnp.dot(o, wo_ref[...],
                         preferred_element_type=jnp.float32) + bo_ref[...]

    # ---- MLP (Linear -> GELU -> Linear) on the CLS row only ----
    m = _layernorm(x1, ln2g_ref[...], ln2b_ref[...])
    m = jnp.dot(m, w1_ref[...], preferred_element_type=jnp.float32) + b1_ref[...]
    m = _gelu(m)
    m = jnp.dot(m, w2_ref[...], preferred_element_type=jnp.float32) + b2_ref[...]
    x2 = x1 + m                                                 # residual 2

    # ---- final encoder LayerNorm; lane-dense (Bb, D) output ----
    out_ref[...] = _layernorm(x2, lnfg_ref[...], lnfb_ref[...])


def _pick_batch_block(B, S, target_rows=256):
    """Largest divisor of B with b_blk * S <= ~target_rows (fills MXU rows)."""
    target_b = max(1, target_rows // max(S, 1))
    b_blk = 1
    for d in range(1, B + 1):
        if B % d == 0 and d <= target_b:
            b_blk = d
    return b_blk


def vit_same_forward(feat, params, num_heads):
    B, S, D = feat.shape
    assert D % 128 == 0, "hidden dim must be lane-dense (multiple of 128)"
    assert D % num_heads == 0, "num_heads must divide hidden dim"

    # Split the fused QKV projection: Q is applied to the CLS row only, K/V to all rows.
    wqkv, bqkv = params["wqkv"], params["bqkv"]
    wq, wkv = wqkv[:, :D], wqkv[:, D:]
    bq, bkv = bqkv[:, :D], bqkv[:, D:]

    weight_args = [wq, bq, wkv, bkv,
                   params["wo"], params["bo"],
                   params["ln1g"], params["ln1b"],
                   params["ln2g"], params["ln2b"],
                   params["w1"], params["b1"], params["w2"], params["b2"],
                   params["lnfg"], params["lnfb"]]

    b_blk = _pick_batch_block(B, S)
    grid = (B // b_blk,)

    def _const_spec(arr):
        nd = arr.ndim
        return pl.BlockSpec(arr.shape, lambda b, _nd=nd: (0,) * _nd)

    in_specs = ([pl.BlockSpec((b_blk, S, D), lambda b: (b, 0, 0))]
                + [_const_spec(a) for a in weight_args])
    out_specs = pl.BlockSpec((b_blk, D), lambda b: (b, 0))

    cls_post_ln = pl.pallas_call(
        functools.partial(vit_cls_kernel, num_heads=num_heads),
        out_shape=jax.ShapeDtypeStruct((B, D), jnp.float32),
        grid=grid,
        in_specs=in_specs,
        out_specs=out_specs,
        scratch_shapes=[pltpu.VMEM((b_blk, S, 2 * D), jnp.float32)],
        compiler_params=pltpu.CompilerParams(
            dimension_semantics=("parallel",)),
    )(feat, *weight_args)

    # Classification head as one batched, MXU-friendly matmul outside the kernel
    # (keeps the kernel output lane-dense even when num_classes < 128).
    return cls_post_ln @ params["wh"] + params["bh"]


def reference(feat, params, num_heads):
    """Pure-JAX reference (same math as the PyTorch forward)."""
    B, S, D = feat.shape
    hd = D // num_heads

    def ln(y, g, b):
        mean = jnp.mean(y, axis=-1, keepdims=True)
        var = jnp.mean((y - mean) ** 2, axis=-1, keepdims=True)
        return (y - mean) * lax.rsqrt(var + LN_EPS) * g.reshape(1, 1, -1) + b.reshape(1, 1, -1)

    x = feat
    h = ln(x, params["ln1g"], params["ln1b"])
    qkv = h @ params["wqkv"] + params["bqkv"]
    q, k, v = jnp.split(qkv, 3, axis=-1)
    q = q.reshape(B, S, num_heads, hd).transpose(0, 2, 1, 3)
    k = k.reshape(B, S, num_heads, hd).transpose(0, 2, 1, 3)
    v = v.reshape(B, S, num_heads, hd).transpose(0, 2, 1, 3)
    s = jnp.einsum("bhqd,bhkd->bhqk", q, k) / math.sqrt(hd)
    p = jax.nn.softmax(s, axis=-1)
    o = jnp.einsum("bhqk,bhkd->bhqd", p, v).transpose(0, 2, 1, 3).reshape(B, S, D)
    x = x + (o @ params["wo"] + params["bo"])
    h = ln(x, params["ln2g"], params["ln2b"])
    h = jax.nn.gelu(h @ params["w1"] + params["b1"], approximate=False)
    h = h @ params["w2"] + params["b2"]
    x = x + h
    z = ln(x, params["lnfg"], params["lnfb"])
    cls = z[:, 0]
    return cls @ params["wh"] + params["bh"]


if __name__ == "__main__":
    # Small ViT-like shapes: batch=2, seq=8 tokens (CLS first), hidden=128,
    # 4 heads, mlp=256, 16 classes.
    B, S, D = 2, 8, 128
    num_heads, M, C = 4, 256, 16

    key = jax.random.PRNGKey(0)
    ks = jax.random.split(key, 17)
    sc = 0.05
    feat = jax.random.normal(ks[0], (B, S, D), jnp.float32)
    params = dict(
        wqkv=sc * jax.random.normal(ks[1], (D, 3 * D), jnp.float32),   # = in_proj_weight.T
        bqkv=sc * jax.random.normal(ks[2], (1, 3 * D), jnp.float32),
        wo=sc * jax.random.normal(ks[3], (D, D), jnp.float32),         # = out_proj.weight.T
        bo=sc * jax.random.normal(ks[4], (1, D), jnp.float32),
        ln1g=1.0 + sc * jax.random.normal(ks[5], (1, D), jnp.float32),
        ln1b=sc * jax.random.normal(ks[6], (1, D), jnp.float32),
        ln2g=1.0 + sc * jax.random.normal(ks[7], (1, D), jnp.float32),
        ln2b=sc * jax.random.normal(ks[8], (1, D), jnp.float32),
        w1=sc * jax.random.normal(ks[9], (D, M), jnp.float32),
        b1=sc * jax.random.normal(ks[10], (1, M), jnp.float32),
        w2=sc * jax.random.normal(ks[11], (M, D), jnp.float32),
        b2=sc * jax.random.normal(ks[12], (1, D), jnp.float32),
        lnfg=1.0 + sc * jax.random.normal(ks[13], (1, D), jnp.float32),
        lnfb=sc * jax.random.normal(ks[14], (1, D), jnp.float32),
        wh=sc * jax.random.normal(ks[15], (D, C), jnp.float32),        # = head.weight.T
        bh=sc * jax.random.normal(ks[16], (1, C), jnp.float32),
    )

    out = jax.block_until_ready(vit_same_forward(feat, params, num_heads))
    ref = reference(feat, params, num_heads)
    assert out.shape == (B, C)
    err = float(jnp.max(jnp.abs(out - ref)))
    assert jnp.allclose(out, ref, atol=1e-4, rtol=1e-4), err
    print("KERNEL_OK")
</pallas_src>

<mosaic_0001>
module attributes {stable_mosaic.version = 11 : i64} {
  func.func @vit_cls_kernel(%arg0: i32, %arg1: memref<2x8x128xf32, #tpu.memory_space<vmem>>, %arg2: memref<128x128xf32, #tpu.memory_space<vmem>>, %arg3: memref<1x128xf32, #tpu.memory_space<vmem>>, %arg4: memref<128x256xf32, #tpu.memory_space<vmem>>, %arg5: memref<1x256xf32, #tpu.memory_space<vmem>>, %arg6: memref<128x128xf32, #tpu.memory_space<vmem>>, %arg7: memref<1x128xf32, #tpu.memory_space<vmem>>, %arg8: memref<1x128xf32, #tpu.memory_space<vmem>>, %arg9: memref<1x128xf32, #tpu.memory_space<vmem>>, %arg10: memref<1x128xf32, #tpu.memory_space<vmem>>, %arg11: memref<1x128xf32, #tpu.memory_space<vmem>>, %arg12: memref<128x256xf32, #tpu.memory_space<vmem>>, %arg13: memref<1x256xf32, #tpu.memory_space<vmem>>, %arg14: memref<256x128xf32, #tpu.memory_space<vmem>>, %arg15: memref<1x128xf32, #tpu.memory_space<vmem>>, %arg16: memref<1x128xf32, #tpu.memory_space<vmem>>, %arg17: memref<1x128xf32, #tpu.memory_space<vmem>>, %arg18: memref<2x128xf32, #tpu.memory_space<vmem>>, %arg19: memref<2x8x256xf32, #tpu.memory_space<vmem>>) attributes {dimension_semantics = [#tpu.dimension_semantics<parallel>], iteration_bounds = array<i64: 1>, scalar_prefetch = 0 : i64, scratch_operands = 1 : i64, tpu.core_type = #tpu.core_type<tc>, window_params = [{transform_indices = @transform_0, window_bounds = array<i64: 2, 8, 128>}, {pipeline_mode = #tpu.pipeline_mode<synchronous>, transform_indices = @transform_1, window_bounds = array<i64: 128, 128>}, {pipeline_mode = #tpu.pipeline_mode<synchronous>, transform_indices = @transform_2, window_bounds = array<i64: 1, 128>}, {pipeline_mode = #tpu.pipeline_mode<synchronous>, transform_indices = @transform_3, window_bounds = array<i64: 128, 256>}, {pipeline_mode = #tpu.pipeline_mode<synchronous>, transform_indices = @transform_4, window_bounds = array<i64: 1, 256>}, {pipeline_mode = #tpu.pipeline_mode<synchronous>, transform_indices = @transform_5, window_bounds = array<i64: 128, 128>}, {pipeline_mode = #tpu.pipeline_mode<synchronous>, transform_indices = @transform_6, window_bounds = array<i64: 1, 128>}, {pipeline_mode = #tpu.pipeline_mode<synchronous>, transform_indices = @transform_7, window_bounds = array<i64: 1, 128>}, {pipeline_mode = #tpu.pipeline_mode<synchronous>, transform_indices = @transform_8, window_bounds = array<i64: 1, 128>}, {pipeline_mode = #tpu.pipeline_mode<synchronous>, transform_indices = @transform_9, window_bounds = array<i64: 1, 128>}, {pipeline_mode = #tpu.pipeline_mode<synchronous>, transform_indices = @transform_10, window_bounds = array<i64: 1, 128>}, {pipeline_mode = #tpu.pipeline_mode<synchronous>, transform_indices = @transform_11, window_bounds = array<i64: 128, 256>}, {pipeline_mode = #tpu.pipeline_mode<synchronous>, transform_indices = @transform_12, window_bounds = array<i64: 1, 256>}, {pipeline_mode = #tpu.pipeline_mode<synchronous>, transform_indices = @transform_13, window_bounds = array<i64: 256, 128>}, {pipeline_mode = #tpu.pipeline_mode<synchronous>, transform_indices = @transform_14, window_bounds = array<i64: 1, 128>}, {pipeline_mode = #tpu.pipeline_mode<synchronous>, transform_indices = @transform_15, window_bounds = array<i64: 1, 128>}, {pipeline_mode = #tpu.pipeline_mode<synchronous>, transform_indices = @transform_16, window_bounds = array<i64: 1, 128>}, {transform_indices = @transform_17, window_bounds = array<i64: 2, 128>}]} {
    %c0 = arith.constant 0 : index
    %c0_0 = arith.constant 0 : index
    %c0_1 = arith.constant 0 : index
    %0 = vector.load %arg1[%c0, %c0_0, %c0_1] : memref<2x8x128xf32, #tpu.memory_space<vmem>>, vector<2x8x128xf32>
    %c0_2 = arith.constant 0 : index
    %c0_3 = arith.constant 0 : index
    %1 = vector.load %arg8[%c0_2, %c0_3] : memref<1x128xf32, #tpu.memory_space<vmem>>, vector<1x128xf32>
    %c0_4 = arith.constant 0 : index
    %c0_5 = arith.constant 0 : index
    %2 = vector.load %arg9[%c0_4, %c0_5] : memref<1x128xf32, #tpu.memory_space<vmem>>, vector<1x128xf32>
    %cst = arith.constant dense<0.000000e+00> : vector<2x8xf32>
    %3 = vector.multi_reduction <add>, %0, %cst [2] : vector<2x8x128xf32> to vector<2x8xf32>
    %4 = vector.shape_cast %3 : vector<2x8xf32> to vector<2x8x1xf32>
    %cst_6 = arith.constant 1.280000e+02 : f32
    %5 = vector.broadcast %cst_6 : f32 to vector<2x8x1xf32>
    %6 = arith.divf %4, %5 : vector<2x8x1xf32>
    %7 = vector.broadcast %6 : vector<2x8x1xf32> to vector<2x8x128xf32>
    %8 = arith.subf %0, %7 : vector<2x8x128xf32>
    %9 = arith.mulf %8, %8 : vector<2x8x128xf32>
    %cst_7 = arith.constant dense<0.000000e+00> : vector<2x8xf32>
    %10 = vector.multi_reduction <add>, %9, %cst_7 [2] : vector<2x8x128xf32> to vector<2x8xf32>
    %11 = vector.shape_cast %10 : vector<2x8xf32> to vector<2x8x1xf32>
    %cst_8 = arith.constant 1.280000e+02 : f32
    %12 = vector.broadcast %cst_8 : f32 to vector<2x8x1xf32>
    %13 = arith.divf %11, %12 : vector<2x8x1xf32>
    %14 = vector.broadcast %6 : vector<2x8x1xf32> to vector<2x8x128xf32>
    %15 = arith.subf %0, %14 : vector<2x8x128xf32>
    %cst_9 = arith.constant 9.99999997E-7 : f32
    %16 = vector.broadcast %cst_9 : f32 to vector<2x8x1xf32>
    %17 = arith.addf %13, %16 : vector<2x8x1xf32>
    %18 = math.rsqrt %17 : vector<2x8x1xf32>
    %19 = vector.broadcast %18 : vector<2x8x1xf32> to vector<2x8x128xf32>
    %20 = arith.mulf %15, %19 : vector<2x8x128xf32>
    %21 = vector.shape_cast %1 : vector<1x128xf32> to vector<1x1x128xf32>
    %22 = vector.broadcast %21 : vector<1x1x128xf32> to vector<2x8x128xf32>
    %23 = arith.mulf %20, %22 : vector<2x8x128xf32>
    %24 = vector.shape_cast %2 : vector<1x128xf32> to vector<1x1x128xf32>
    %25 = vector.broadcast %24 : vector<1x1x128xf32> to vector<2x8x128xf32>
    %26 = arith.addf %23, %25 : vector<2x8x128xf32>
    %27 = vector.shape_cast %26 : vector<2x8x128xf32> to vector<16x128xf32>
    %c0_10 = arith.constant 0 : index
    %c0_11 = arith.constant 0 : index
    %28 = vector.load %arg4[%c0_10, %c0_11] : memref<128x256xf32, #tpu.memory_space<vmem>>, vector<128x256xf32>
    %cst_12 = arith.constant dense<0.000000e+00> : vector<16x256xf32>
    %29 = tpu.matmul %27, %28, %cst_12 {dimension_numbers = #tpu.dot_dimension_numbers<[1], [0], [0], [1], [0, 0, 1, 1], [], []>} : vector<16x128xf32>, vector<128x256xf32>, vector<16x256xf32> -> vector<16x256xf32>
    %c0_13 = arith.constant 0 : index
    %c0_14 = arith.constant 0 : index
    %30 = vector.load %arg5[%c0_13, %c0_14] : memref<1x256xf32, #tpu.memory_space<vmem>>, vector<1x256xf32>
    %31 = vector.broadcast %30 : vector<1x256xf32> to vector<16x256xf32>
    %32 = arith.addf %29, %31 : vector<16x256xf32>
    %33 = vector.shape_cast %32 : vector<16x256xf32> to vector<2x8x256xf32>
    %c0_15 = arith.constant 0 : index
    %c0_16 = arith.constant 0 : index
    %c0_17 = arith.constant 0 : index
    %34 = vector.load %arg19[%c0_15, %c0_16, %c0_17] : memref<2x8x256xf32, #tpu.memory_space<vmem>>, vector<2x8x256xf32>
    tpu.vector_store %arg19[%c0_15, %c0_16, %c0_17], %33 {strides = array<i32>} : memref<2x8x256xf32, #tpu.memory_space<vmem>>, vector<2x8x256xf32>,
    %35 = vector.extract_strided_slice %26 {offsets = [0, 0, 0], sizes = [2, 1, 128], strides = [1, 1, 1]} : vector<2x8x128xf32> to vector<2x1x128xf32>
    %36 = vector.shape_cast %35 : vector<2x1x128xf32> to vector<2x128xf32>
    %c0_18 = arith.constant 0 : index
    %c0_19 = arith.constant 0 : index
    %37 = vector.load %arg2[%c0_18, %c0_19] : memref<128x128xf32, #tpu.memory_space<vmem>>, vector<128x128xf32>
    %cst_20 = arith.constant dense<0.000000e+00> : vector<2x128xf32>
    %38 = tpu.matmul %36, %37, %cst_20 {dimension_numbers = #tpu.dot_dimension_numbers<[1], [0], [0], [1], [0, 0, 1, 1], [], []>} : vector<2x128xf32>, vector<128x128xf32>, vector<2x128xf32> -> vector<2x128xf32>
    %c0_21 = arith.constant 0 : index
    %c0_22 = arith.constant 0 : index
    %39 = vector.load %arg3[%c0_21, %c0_22] : memref<1x128xf32, #tpu.memory_space<vmem>>, vector<1x128xf32>
    %40 = vector.broadcast %39 : vector<1x128xf32> to vector<2x128xf32>
    %41 = arith.addf %38, %40 : vector<2x128xf32>
    %cst_23 = arith.constant 0.176776692 : f32
    %42 = vector.broadcast %cst_23 : f32 to vector<2x128xf32>
    %43 = arith.mulf %41, %42 : vector<2x128xf32>
    %44 = vector.extract_strided_slice %43 {offsets = [0, 0], sizes = [2, 32], strides = [1, 1]} : vector<2x128xf32> to vector<2x32xf32>
    %c0_24 = arith.constant 0 : index
    %c0_25 = arith.constant 0 : index
    %c0_26 = arith.constant 0 : index
    %45 = vector.load %arg19[%c0_24, %c0_25, %c0_26] : memref<2x8x256xf32, #tpu.memory_space<vmem>>, vector<2x8x32xf32>
    %c0_27 = arith.constant 0 : index
    %c0_28 = arith.constant 0 : index
    %c128 = arith.constant 128 : index
    %46 = vector.load %arg19[%c0_27, %c0_28, %c128] : memref<2x8x256xf32, #tpu.memory_space<vmem>>, vector<2x8x32xf32>
    %47 = vector.shape_cast %44 : vector<2x32xf32> to vector<2x1x32xf32>
    %48 = vector.broadcast %47 : vector<2x1x32xf32> to vector<2x8x32xf32>
    %49 = arith.mulf %48, %45 : vector<2x8x32xf32>
    %cst_29 = arith.constant dense<0.000000e+00> : vector<2x8xf32>
    %50 = vector.multi_reduction <add>, %49, %cst_29 [2] : vector<2x8x32xf32> to vector<2x8xf32>
    %51 = vector.shape_cast %50 : vector<2x8xf32> to vector<2x8x1xf32>
    %cst_30 = arith.constant dense<0xFF800000> : vector<2x1xf32>
    %52 = vector.multi_reduction <maximumf>, %51, %cst_30 [1] : vector<2x8x1xf32> to vector<2x1xf32>
    %53 = vector.shape_cast %52 : vector<2x1xf32> to vector<2x1x1xf32>
    %54 = vector.broadcast %53 : vector<2x1x1xf32> to vector<2x8x1xf32>
    %55 = arith.subf %51, %54 : vector<2x8x1xf32>
    %56 = math.exp %55 : vector<2x8x1xf32>
    %cst_31 = arith.constant dense<0.000000e+00> : vector<2x1xf32>
    %57 = vector.multi_reduction <add>, %56, %cst_31 [1] : vector<2x8x1xf32> to vector<2x1xf32>
    %58 = vector.shape_cast %57 : vector<2x1xf32> to vector<2x1x1xf32>
    %59 = tpu.reciprocal %58 : vector<2x1x1xf32> -> vector<2x1x1xf32>
    %60 = vector.broadcast %59 : vector<2x1x1xf32> to vector<2x8x1xf32>
    %61 = arith.mulf %56, %60 : vector<2x8x1xf32>
    %62 = vector.broadcast %61 : vector<2x8x1xf32> to vector<2x8x32xf32>
    %63 = arith.mulf %62, %46 : vector<2x8x32xf32>
    %cst_32 = arith.constant dense<0.000000e+00> : vector<2x32xf32>
    %64 = vector.multi_reduction <add>, %63, %cst_32 [1] : vector<2x8x32xf32> to vector<2x32xf32>
    %65 = vector.extract_strided_slice %43 {offsets = [0, 32], sizes = [2, 32], strides = [1, 1]} : vector<2x128xf32> to vector<2x32xf32>
    %c0_33 = arith.constant 0 : index
    %c0_34 = arith.constant 0 : index
    %c32 = arith.constant 32 : index
    %66 = vector.load %arg19[%c0_33, %c0_34, %c32] : memref<2x8x256xf32, #tpu.memory_space<vmem>>, vector<2x8x32xf32>
    %c0_35 = arith.constant 0 : index
    %c0_36 = arith.constant 0 : index
    %c160 = arith.constant 160 : index
    %67 = vector.load %arg19[%c0_35, %c0_36, %c160] : memref<2x8x256xf32, #tpu.memory_space<vmem>>, vector<2x8x32xf32>
    %68 = vector.shape_cast %65 : vector<2x32xf32> to vector<2x1x32xf32>
    %69 = vector.broadcast %68 : vector<2x1x32xf32> to vector<2x8x32xf32>
    %70 = arith.mulf %69, %66 : vector<2x8x32xf32>
    %cst_37 = arith.constant dense<0.000000e+00> : vector<2x8xf32>
    %71 = vector.multi_reduction <add>, %70, %cst_37 [2] : vector<2x8x32xf32> to vector<2x8xf32>
    %72 = vector.shape_cast %71 : vector<2x8xf32> to vector<2x8x1xf32>
    %cst_38 = arith.constant dense<0xFF800000> : vector<2x1xf32>
    %73 = vector.multi_reduction <maximumf>, %72, %cst_38 [1] : vector<2x8x1xf32> to vector<2x1xf32>
    %74 = vector.shape_cast %73 : vector<2x1xf32> to vector<2x1x1xf32>
    %75 = vector.broadcast %74 : vector<2x1x1xf32> to vector<2x8x1xf32>
    %76 = arith.subf %72, %75 : vector<2x8x1xf32>
    %77 = math.exp %76 : vector<2x8x1xf32>
    %cst_39 = arith.constant dense<0.000000e+00> : vector<2x1xf32>
    %78 = vector.multi_reduction <add>, %77, %cst_39 [1] : vector<2x8x1xf32> to vector<2x1xf32>
    %79 = vector.shape_cast %78 : vector<2x1xf32> to vector<2x1x1xf32>
    %80 = tpu.reciprocal %79 : vector<2x1x1xf32> -> vector<2x1x1xf32>
    %81 = vector.broadcast %80 : vector<2x1x1xf32> to vector<2x8x1xf32>
    %82 = arith.mulf %77, %81 : vector<2x8x1xf32>
    %83 = vector.broadcast %82 : vector<2x8x1xf32> to vector<2x8x32xf32>
    %84 = arith.mulf %83, %67 : vector<2x8x32xf32>
    %cst_40 = arith.constant dense<0.000000e+00> : vector<2x32xf32>
    %85 = vector.multi_reduction <add>, %84, %cst_40 [1] : vector<2x8x32xf32> to vector<2x32xf32>
    %86 = vector.extract_strided_slice %43 {offsets = [0, 64], sizes = [2, 32], strides = [1, 1]} : vector<2x128xf32> to vector<2x32xf32>
    %c0_41 = arith.constant 0 : index
    %c0_42 = arith.constant 0 : index
    %c64 = arith.constant 64 : index
    %87 = vector.load %arg19[%c0_41, %c0_42, %c64] : memref<2x8x256xf32, #tpu.memory_space<vmem>>, vector<2x8x32xf32>
    %c0_43 = arith.constant 0 : index
    %c0_44 = arith.constant 0 : index
    %c192 = arith.constant 192 : index
    %88 = vector.load %arg19[%c0_43, %c0_44, %c192] : memref<2x8x256xf32, #tpu.memory_space<vmem>>, vector<2x8x32xf32>
    %89 = vector.shape_cast %86 : vector<2x32xf32> to vector<2x1x32xf32>
    %90 = vector.broadcast %89 : vector<2x1x32xf32> to vector<2x8x32xf32>
    %91 = arith.mulf %90, %87 : vector<2x8x32xf32>
    %cst_45 = arith.constant dense<0.000000e+00> : vector<2x8xf32>
    %92 = vector.multi_reduction <add>, %91, %cst_45 [2] : vector<2x8x32xf32> to vector<2x8xf32>
    %93 = vector.shape_cast %92 : vector<2x8xf32> to vector<2x8x1xf32>
    %cst_46 = arith.constant dense<0xFF800000> : vector<2x1xf32>
    %94 = vector.multi_reduction <maximumf>, %93, %cst_46 [1] : vector<2x8x1xf32> to vector<2x1xf32>
    %95 = vector.shape_cast %94 : vector<2x1xf32> to vector<2x1x1xf32>
    %96 = vector.broadcast %95 : vector<2x1x1xf32> to vector<2x8x1xf32>
    %97 = arith.subf %93, %96 : vector<2x8x1xf32>
    %98 = math.exp %97 : vector<2x8x1xf32>
    %cst_47 = arith.constant dense<0.000000e+00> : vector<2x1xf32>
    %99 = vector.multi_reduction <add>, %98, %cst_47 [1] : vector<2x8x1xf32> to vector<2x1xf32>
    %100 = vector.shape_cast %99 : vector<2x1xf32> to vector<2x1x1xf32>
    %101 = tpu.reciprocal %100 : vector<2x1x1xf32> -> vector<2x1x1xf32>
    %102 = vector.broadcast %101 : vector<2x1x1xf32> to vector<2x8x1xf32>
    %103 = arith.mulf %98, %102 : vector<2x8x1xf32>
    %104 = vector.broadcast %103 : vector<2x8x1xf32> to vector<2x8x32xf32>
    %105 = arith.mulf %104, %88 : vector<2x8x32xf32>
    %cst_48 = arith.constant dense<0.000000e+00> : vector<2x32xf32>
    %106 = vector.multi_reduction <add>, %105, %cst_48 [1] : vector<2x8x32xf32> to vector<2x32xf32>
    %107 = vector.extract_strided_slice %43 {offsets = [0, 96], sizes = [2, 32], strides = [1, 1]} : vector<2x128xf32> to vector<2x32xf32>
    %c0_49 = arith.constant 0 : index
    %c0_50 = arith.constant 0 : index
    %c96 = arith.constant 96 : index
    %108 = vector.load %arg19[%c0_49, %c0_50, %c96] : memref<2x8x256xf32, #tpu.memory_space<vmem>>, vector<2x8x32xf32>
    %c0_51 = arith.constant 0 : index
    %c0_52 = arith.constant 0 : index
    %c224 = arith.constant 224 : index
    %109 = vector.load %arg19[%c0_51, %c0_52, %c224] : memref<2x8x256xf32, #tpu.memory_space<vmem>>, vector<2x8x32xf32>
    %110 = vector.shape_cast %107 : vector<2x32xf32> to vector<2x1x32xf32>
    %111 = vector.broadcast %110 : vector<2x1x32xf32> to vector<2x8x32xf32>
    %112 = arith.mulf %111, %108 : vector<2x8x32xf32>
    %cst_53 = arith.constant dense<0.000000e+00> : vector<2x8xf32>
    %113 = vector.multi_reduction <add>, %112, %cst_53 [2] : vector<2x8x32xf32> to vector<2x8xf32>
    %114 = vector.shape_cast %113 : vector<2x8xf32> to vector<2x8x1xf32>
    %cst_54 = arith.constant dense<0xFF800000> : vector<2x1xf32>
    %115 = vector.multi_reduction <maximumf>, %114, %cst_54 [1] : vector<2x8x1xf32> to vector<2x1xf32>
    %116 = vector.shape_cast %115 : vector<2x1xf32> to vector<2x1x1xf32>
    %117 = vector.broadcast %116 : vector<2x1x1xf32> to vector<2x8x1xf32>
    %118 = arith.subf %114, %117 : vector<2x8x1xf32>
    %119 = math.exp %118 : vector<2x8x1xf32>
    %cst_55 = arith.constant dense<0.000000e+00> : vector<2x1xf32>
    %120 = vector.multi_reduction <add>, %119, %cst_55 [1] : vector<2x8x1xf32> to vector<2x1xf32>
    %121 = vector.shape_cast %120 : vector<2x1xf32> to vector<2x1x1xf32>
    %122 = tpu.reciprocal %121 : vector<2x1x1xf32> -> vector<2x1x1xf32>
    %123 = vector.broadcast %122 : vector<2x1x1xf32> to vector<2x8x1xf32>
    %124 = arith.mulf %119, %123 : vector<2x8x1xf32>
    %125 = vector.broadcast %124 : vector<2x8x1xf32> to vector<2x8x32xf32>
    %126 = arith.mulf %125, %109 : vector<2x8x32xf32>
    %cst_56 = arith.constant dense<0.000000e+00> : vector<2x32xf32>
    %127 = vector.multi_reduction <add>, %126, %cst_56 [1] : vector<2x8x32xf32> to vector<2x32xf32>
    %128 = tpu.concatenate %64, %85, %106, %127 in 1 : vector<2x32xf32>, vector<2x32xf32>, vector<2x32xf32>, vector<2x32xf32> -> vector<2x128xf32>
    %129 = vector.extract_strided_slice %0 {offsets = [0, 0, 0], sizes = [2, 1, 128], strides = [1, 1, 1]} : vector<2x8x128xf32> to vector<2x1x128xf32>
    %130 = vector.shape_cast %129 : vector<2x1x128xf32> to vector<2x128xf32>
    %c0_57 = arith.constant 0 : index
    %c0_58 = arith.constant 0 : index
    %131 = vector.load %arg6[%c0_57, %c0_58] : memref<128x128xf32, #tpu.memory_space<vmem>>, vector<128x128xf32>
    %cst_59 = arith.constant dense<0.000000e+00> : vector<2x128xf32>
    %132 = tpu.matmul %128, %131, %cst_59 {dimension_numbers = #tpu.dot_dimension_numbers<[1], [0], [0], [1], [0, 0, 1, 1], [], []>} : vector<2x128xf32>, vector<128x128xf32>, vector<2x128xf32> -> vector<2x128xf32>
    %133 = arith.addf %130, %132 : vector<2x128xf32>
    %c0_60 = arith.constant 0 : index
    %c0_61 = arith.constant 0 : index
    %134 = vector.load %arg7[%c0_60, %c0_61] : memref<1x128xf32, #tpu.memory_space<vmem>>, vector<1x128xf32>
    %135 = vector.broadcast %134 : vector<1x128xf32> to vector<2x128xf32>
    %136 = arith.addf %133, %135 : vector<2x128xf32>
    %c0_62 = arith.constant 0 : index
    %c0_63 = arith.constant 0 : index
    %137 = vector.load %arg10[%c0_62, %c0_63] : memref<1x128xf32, #tpu.memory_space<vmem>>, vector<1x128xf32>
    %c0_64 = arith.constant 0 : index
    %c0_65 = arith.constant 0 : index
    %138 = vector.load %arg11[%c0_64, %c0_65] : memref<1x128xf32, #tpu.memory_space<vmem>>, vector<1x128xf32>
    %cst_66 = arith.constant dense<0.000000e+00> : vector<2xf32>
    %139 = vector.multi_reduction <add>, %136, %cst_66 [1] : vector<2x128xf32> to vector<2xf32>
    %140 = vector.shape_cast %139 : vector<2xf32> to vector<2x1xf32>
    %cst_67 = arith.constant 1.280000e+02 : f32
    %141 = vector.broadcast %cst_67 : f32 to vector<2x1xf32>
    %142 = arith.divf %140, %141 : vector<2x1xf32>
    %143 = vector.broadcast %142 : vector<2x1xf32> to vector<2x128xf32>
    %144 = arith.subf %136, %143 : vector<2x128xf32>
    %145 = arith.mulf %144, %144 : vector<2x128xf32>
    %cst_68 = arith.constant dense<0.000000e+00> : vector<2xf32>
    %146 = vector.multi_reduction <add>, %145, %cst_68 [1] : vector<2x128xf32> to vector<2xf32>
    %147 = vector.shape_cast %146 : vector<2xf32> to vector<2x1xf32>
    %cst_69 = arith.constant 1.280000e+02 : f32
    %148 = vector.broadcast %cst_69 : f32 to vector<2x1xf32>
    %149 = arith.divf %147, %148 : vector<2x1xf32>
    %150 = vector.broadcast %142 : vector<2x1xf32> to vector<2x128xf32>
    %151 = arith.subf %136, %150 : vector<2x128xf32>
    %cst_70 = arith.constant 9.99999997E-7 : f32
    %152 = vector.broadcast %cst_70 : f32 to vector<2x1xf32>
    %153 = arith.addf %149, %152 : vector<2x1xf32>
    %154 = math.rsqrt %153 : vector<2x1xf32>
    %155 = vector.broadcast %154 : vector<2x1xf32> to vector<2x128xf32>
    %156 = arith.mulf %151, %155 : vector<2x128xf32>
    %157 = vector.broadcast %137 : vector<1x128xf32> to vector<2x128xf32>
    %158 = arith.mulf %156, %157 : vector<2x128xf32>
    %159 = vector.broadcast %138 : vector<1x128xf32> to vector<2x128xf32>
    %160 = arith.addf %158, %159 : vector<2x128xf32>
    %c0_71 = arith.constant 0 : index
    %c0_72 = arith.constant 0 : index
    %161 = vector.load %arg12[%c0_71, %c0_72] : memref<128x256xf32, #tpu.memory_space<vmem>>, vector<128x256xf32>
    %cst_73 = arith.constant dense<0.000000e+00> : vector<2x256xf32>
    %162 = tpu.matmul %160, %161, %cst_73 {dimension_numbers = #tpu.dot_dimension_numbers<[1], [0], [0], [1], [0, 0, 1, 1], [], []>} : vector<2x128xf32>, vector<128x256xf32>, vector<2x256xf32> -> vector<2x256xf32>
    %c0_74 = arith.constant 0 : index
    %c0_75 = arith.constant 0 : index
    %163 = vector.load %arg13[%c0_74, %c0_75] : memref<1x256xf32, #tpu.memory_space<vmem>>, vector<1x256xf32>
    %164 = vector.broadcast %163 : vector<1x256xf32> to vector<2x256xf32>
    %165 = arith.addf %162, %164 : vector<2x256xf32>
    %cst_76 = arith.constant 5.000000e-01 : f32
    %166 = vector.broadcast %cst_76 : f32 to vector<2x256xf32>
    %167 = arith.mulf %166, %165 : vector<2x256xf32>
    %cst_77 = arith.constant 0.707106769 : f32
    %168 = vector.broadcast %cst_77 : f32 to vector<2x256xf32>
    %169 = arith.mulf %165, %168 : vector<2x256xf32>
    %170 = math.absf %169 : vector<2x256xf32>
    %cst_78 = arith.constant 0.327591091 : f32
    %171 = vector.broadcast %cst_78 : f32 to vector<2x256xf32>
    %172 = arith.mulf %171, %170 : vector<2x256xf32>
    %cst_79 = arith.constant 1.000000e+00 : f32
    %173 = vector.broadcast %cst_79 : f32 to vector<2x256xf32>
    %174 = arith.addf %173, %172 : vector<2x256xf32>
    %cst_80 = arith.constant 1.000000e+00 : f32
    %175 = vector.broadcast %cst_80 : f32 to vector<2x256xf32>
    %176 = arith.divf %175, %174 : vector<2x256xf32>
    %cst_81 = arith.constant 1.06140542 : f32
    %177 = vector.broadcast %cst_81 : f32 to vector<2x256xf32>
    %178 = arith.mulf %177, %176 : vector<2x256xf32>
    %cst_82 = arith.constant -1.45315206 : f32
    %179 = vector.broadcast %cst_82 : f32 to vector<2x256xf32>
    %180 = arith.addf %178, %179 : vector<2x256xf32>
    %181 = arith.mulf %180, %176 : vector<2x256xf32>
    %cst_83 = arith.constant 1.42141378 : f32
    %182 = vector.broadcast %cst_83 : f32 to vector<2x256xf32>
    %183 = arith.addf %181, %182 : vector<2x256xf32>
    %184 = arith.mulf %183, %176 : vector<2x256xf32>
    %cst_84 = arith.constant -0.284496725 : f32
    %185 = vector.broadcast %cst_84 : f32 to vector<2x256xf32>
    %186 = arith.addf %184, %185 : vector<2x256xf32>
    %187 = arith.mulf %186, %176 : vector<2x256xf32>
    %cst_85 = arith.constant 0.254829586 : f32
    %188 = vector.broadcast %cst_85 : f32 to vector<2x256xf32>
    %189 = arith.addf %187, %188 : vector<2x256xf32>
    %190 = arith.mulf %189, %176 : vector<2x256xf32>
    %cst_86 = arith.constant 0.000000e+00 : f32
    %191 = vector.broadcast %cst_86 : f32 to vector<2x256xf32>
    %192 = arith.subf %191, %170 : vector<2x256xf32>
    %193 = arith.mulf %192, %170 : vector<2x256xf32>
    %194 = math.exp %193 : vector<2x256xf32>
    %195 = arith.mulf %190, %194 : vector<2x256xf32>
    %cst_87 = arith.constant 1.000000e+00 : f32
    %196 = vector.broadcast %cst_87 : f32 to vector<2x256xf32>
    %197 = arith.subf %196, %195 : vector<2x256xf32>
    %cst_88 = arith.constant 0.000000e+00 : f32
    %198 = vector.broadcast %cst_88 : f32 to vector<2x256xf32>
    %199 = arith.cmpf oge, %169, %198 : vector<2x256xf32>
    %cst_89 = arith.constant 0.000000e+00 : f32
    %200 = vector.broadcast %cst_89 : f32 to vector<2x256xf32>
    %201 = arith.subf %200, %197 : vector<2x256xf32>
    %202 = arith.select %199, %197, %201 : vector<2x256xi1>, vector<2x256xf32>
    %cst_90 = arith.constant 1.000000e+00 : f32
    %203 = vector.broadcast %cst_90 : f32 to vector<2x256xf32>
    %204 = arith.addf %203, %202 : vector<2x256xf32>
    %205 = arith.mulf %167, %204 : vector<2x256xf32>
    %c0_91 = arith.constant 0 : index
    %c0_92 = arith.constant 0 : index
    %206 = vector.load %arg14[%c0_91, %c0_92] : memref<256x128xf32, #tpu.memory_space<vmem>>, vector<256x128xf32>
    %cst_93 = arith.constant dense<0.000000e+00> : vector<2x128xf32>
    %207 = tpu.matmul %205, %206, %cst_93 {dimension_numbers = #tpu.dot_dimension_numbers<[1], [0], [0], [1], [0, 0, 1, 1], [], []>} : vector<2x256xf32>, vector<256x128xf32>, vector<2x128xf32> -> vector<2x128xf32>
    %c0_94 = arith.constant 0 : index
    %c0_95 = arith.constant 0 : index
    %208 = vector.load %arg15[%c0_94, %c0_95] : memref<1x128xf32, #tpu.memory_space<vmem>>, vector<1x128xf32>
    %209 = vector.broadcast %208 : vector<1x128xf32> to vector<2x128xf32>
    %210 = arith.addf %207, %209 : vector<2x128xf32>
    %211 = arith.addf %136, %210 : vector<2x128xf32>
    %c0_96 = arith.constant 0 : index
    %c0_97 = arith.constant 0 : index
    %212 = vector.load %arg16[%c0_96, %c0_97] : memref<1x128xf32, #tpu.memory_space<vmem>>, vector<1x128xf32>
    %c0_98 = arith.constant 0 : index
    %c0_99 = arith.constant 0 : index
    %213 = vector.load %arg17[%c0_98, %c0_99] : memref<1x128xf32, #tpu.memory_space<vmem>>, vector<1x128xf32>
    %cst_100 = arith.constant dense<0.000000e+00> : vector<2xf32>
    %214 = vector.multi_reduction <add>, %211, %cst_100 [1] : vector<2x128xf32> to vector<2xf32>
    %215 = vector.shape_cast %214 : vector<2xf32> to vector<2x1xf32>
    %cst_101 = arith.constant 1.280000e+02 : f32
    %216 = vector.broadcast %cst_101 : f32 to vector<2x1xf32>
    %217 = arith.divf %215, %216 : vector<2x1xf32>
    %218 = vector.broadcast %217 : vector<2x1xf32> to vector<2x128xf32>
    %219 = arith.subf %211, %218 : vector<2x128xf32>
    %220 = arith.mulf %219, %219 : vector<2x128xf32>
    %cst_102 = arith.constant dense<0.000000e+00> : vector<2xf32>
    %221 = vector.multi_reduction <add>, %220, %cst_102 [1] : vector<2x128xf32> to vector<2xf32>
    %222 = vector.shape_cast %221 : vector<2xf32> to vector<2x1xf32>
    %cst_103 = arith.constant 1.280000e+02 : f32
    %223 = vector.broadcast %cst_103 : f32 to vector<2x1xf32>
    %224 = arith.divf %222, %223 : vector<2x1xf32>
    %225 = vector.broadcast %217 : vector<2x1xf32> to vector<2x128xf32>
    %226 = arith.subf %211, %225 : vector<2x128xf32>
    %cst_104 = arith.constant 9.99999997E-7 : f32
    %227 = vector.broadcast %cst_104 : f32 to vector<2x1xf32>
    %228 = arith.addf %224, %227 : vector<2x1xf32>
    %229 = math.rsqrt %228 : vector<2x1xf32>
    %230 = vector.broadcast %229 : vector<2x1xf32> to vector<2x128xf32>
    %231 = arith.mulf %226, %230 : vector<2x128xf32>
    %232 = vector.broadcast %212 : vector<1x128xf32> to vector<2x128xf32>
    %233 = arith.mulf %231, %232 : vector<2x128xf32>
    %234 = vector.broadcast %213 : vector<1x128xf32> to vector<2x128xf32>
    %235 = arith.addf %233, %234 : vector<2x128xf32>
    %c0_105 = arith.constant 0 : index
    %c0_106 = arith.constant 0 : index
    %236 = vector.load %arg18[%c0_105, %c0_106] : memref<2x128xf32, #tpu.memory_space<vmem>>, vector<2x128xf32>
    tpu.vector_store %arg18[%c0_105, %c0_106], %235 {strides = array<i32>} : memref<2x128xf32, #tpu.memory_space<vmem>>, vector<2x128xf32>,
    return
  }
  func.func @transform_0(%arg0: i32) -> (i32, i32, i32) {
    %c0_i32 = arith.constant 0 : i32
    %c0_i32_0 = arith.constant 0 : i32
    %c0_i32_1 = arith.constant 0 : i32
    return %arg0, %c0_i32, %c0_i32_0 : i32, i32, i32
  }
  func.func @transform_1(%arg0: i32) -> (i32, i32) {
    %c0_i32 = arith.constant 0 : i32
    %c0_i32_0 = arith.constant 0 : i32
    %c0_i32_1 = arith.constant 0 : i32
    return %c0_i32, %c0_i32_0 : i32, i32
  }
  func.func @transform_2(%arg0: i32) -> (i32, i32) {
    %c0_i32 = arith.constant 0 : i32
    %c0_i32_0 = arith.constant 0 : i32
    %c0_i32_1 = arith.constant 0 : i32
    return %c0_i32, %c0_i32_0 : i32, i32
  }
  func.func @transform_3(%arg0: i32) -> (i32, i32) {
    %c0_i32 = arith.constant 0 : i32
    %c0_i32_0 = arith.constant 0 : i32
    %c0_i32_1 = arith.constant 0 : i32
    return %c0_i32, %c0_i32_0 : i32, i32
  }
  func.func @transform_4(%arg0: i32) -> (i32, i32) {
    %c0_i32 = arith.constant 0 : i32
    %c0_i32_0 = arith.constant 0 : i32
    %c0_i32_1 = arith.constant 0 : i32
    return %c0_i32, %c0_i32_0 : i32, i32
  }
  func.func @transform_5(%arg0: i32) -> (i32, i32) {
    %c0_i32 = arith.constant 0 : i32
    %c0_i32_0 = arith.constant 0 : i32
    %c0_i32_1 = arith.constant 0 : i32
    return %c0_i32, %c0_i32_0 : i32, i32
  }
  func.func @transform_6(%arg0: i32) -> (i32, i32) {
    %c0_i32 = arith.constant 0 : i32
    %c0_i32_0 = arith.constant 0 : i32
    %c0_i32_1 = arith.constant 0 : i32
    return %c0_i32, %c0_i32_0 : i32, i32
  }
  func.func @transform_7(%arg0: i32) -> (i32, i32) {
    %c0_i32 = arith.constant 0 : i32
    %c0_i32_0 = arith.constant 0 : i32
    %c0_i32_1 = arith.constant 0 : i32
    return %c0_i32, %c0_i32_0 : i32, i32
  }
  func.func @transform_8(%arg0: i32) -> (i32, i32) {
    %c0_i32 = arith.constant 0 : i32
    %c0_i32_0 = arith.constant 0 : i32
    %c0_i32_1 = arith.constant 0 : i32
    return %c0_i32, %c0_i32_0 : i32, i32
  }
  func.func @transform_9(%arg0: i32) -> (i32, i32) {
    %c0_i32 = arith.constant 0 : i32
    %c0_i32_0 = arith.constant 0 : i32
    %c0_i32_1 = arith.constant 0 : i32
    return %c0_i32, %c0_i32_0 : i32, i32
  }
  func.func @transform_10(%arg0: i32) -> (i32, i32) {
    %c0_i32 = arith.constant 0 : i32
    %c0_i32_0 = arith.constant 0 : i32
    %c0_i32_1 = arith.constant 0 : i32
    return %c0_i32, %c0_i32_0 : i32, i32
  }
  func.func @transform_11(%arg0: i32) -> (i32, i32) {
    %c0_i32 = arith.constant 0 : i32
    %c0_i32_0 = arith.constant 0 : i32
    %c0_i32_1 = arith.constant 0 : i32
    return %c0_i32, %c0_i32_0 : i32, i32
  }
  func.func @transform_12(%arg0: i32) -> (i32, i32) {
    %c0_i32 = arith.constant 0 : i32
    %c0_i32_0 = arith.constant 0 : i32
    %c0_i32_1 = arith.constant 0 : i32
    return %c0_i32, %c0_i32_0 : i32, i32
  }
  func.func @transform_13(%arg0: i32) -> (i32, i32) {
    %c0_i32 = arith.constant 0 : i32
    %c0_i32_0 = arith.constant 0 : i32
    %c0_i32_1 = arith.constant 0 : i32
    return %c0_i32, %c0_i32_0 : i32, i32
  }
  func.func @transform_14(%arg0: i32) -> (i32, i32) {
    %c0_i32 = arith.constant 0 : i32
    %c0_i32_0 = arith.constant 0 : i32
    %c0_i32_1 = arith.constant 0 : i32
    return %c0_i32, %c0_i32_0 : i32, i32
  }
  func.func @transform_15(%arg0: i32) -> (i32, i32) {
    %c0_i32 = arith.constant 0 : i32
    %c0_i32_0 = arith.constant 0 : i32
    %c0_i32_1 = arith.constant 0 : i32
    return %c0_i32, %c0_i32_0 : i32, i32
  }
  func.func @transform_16(%arg0: i32) -> (i32, i32) {
    %c0_i32 = arith.constant 0 : i32
    %c0_i32_0 = arith.constant 0 : i32
    %c0_i32_1 = arith.constant 0 : i32
    return %c0_i32, %c0_i32_0 : i32, i32
  }
  func.func @transform_17(%arg0: i32) -> (i32, i32) {
    %c0_i32 = arith.constant 0 : i32
    %c0_i32_0 = arith.constant 0 : i32
    return %arg0, %c0_i32 : i32, i32
  }
}

</mosaic_0001>

<bundles_post_ra>
// kernel: tpu_custom_call.1
= control target key start
LH: loop header
LB: loop body
LE: loop exit
PB: predicated region body
PF: predicated region fallthrough
CT: control target
= control target key end

     0   :  { %s2140_s0 = inlined_call_operand.hbm [shape: f32[2,8,128], index: 0, kind: input, shape index: {}]   ;;  %s2141_s1 = inlined_call_operand.hbm [shape: f32[128,128], index: 1, kind: input, shape index: {}]   ;;  %s2142_s2 = inlined_call_operand.vmem [shape: f32[1,128], index: 2, kind: input, shape index: {}]   ;;  %s2143_s3 = inlined_call_operand.hbm [shape: f32[128,256], index: 3, kind: input, shape index: {}]   ;;  %s2144_s4 = inlined_call_operand.vmem [shape: f32[1,256], index: 4, kind: input, shape index: {}]   ;;  %s2145_s5 = inlined_call_operand.hbm [shape: f32[128,128], index: 5, kind: input, shape index: {}]   ;;  %s2146_s6 = inlined_call_operand.vmem [shape: f32[1,128], index: 6, kind: input, shape index: {}]   ;;  %s2147_s7 = inlined_call_operand.vmem [shape: f32[1,128], index: 7, kind: input, shape index: {}]   ;;  %s2148_s8 = inlined_call_operand.vmem [shape: f32[1,128], index: 8, kind: input, shape index: {}]   ;;  %s2149_s9 = inlined_call_operand.vmem [shape: f32[1,128], index: 9, kind: input, shape index: {}]   ;;  %s2150_s10 = inlined_call_operand.vmem [shape: f32[1,128], index: 10, kind: input, shape index: {}]   ;;  %s2151_s11 = inlined_call_operand.hbm [shape: f32[128,256], index: 11, kind: input, shape index: {}]   ;;  %s2152_s12 = inlined_call_operand.vmem [shape: f32[1,256], index: 12, kind: input, shape index: {}]   ;;  %s2153_s13 = inlined_call_operand.hbm [shape: f32[256,128], index: 13, kind: input, shape index: {}]   ;;  %s2154_s14 = inlined_call_operand.vmem [shape: f32[1,128], index: 14, kind: input, shape index: {}]   ;;  %s2155_s15 = inlined_call_operand.vmem [shape: f32[1,128], index: 15, kind: input, shape index: {}]   ;;  %s2156_s16 = inlined_call_operand.vmem [shape: f32[1,128], index: 16, kind: input, shape index: {}]   ;;  %s2157_s17 = inlined_call_operand.hbm [shape: f32[2,128], index: 17, kind: output, shape index: {}]  }
   0x1   :  { %2161 = sst [smem:[#allocation20_spill]] %s2140_s0 }
   0x2   :  { %2162 = sst [smem:[#allocation21_spill]] %s2141_s1 }
   0x3   :  { %2163 = sst [smem:[#allocation22_spill]] %s2156_s16 }
   0x4   :  { %2164 = sst [smem:[#allocation23_spill]] %s2157_s17 }
   0x5   :  { %22 = vsyncpa [#allocation4], 0 }
   0x6   :  { %23 = vsyncpa [#allocation7], 0 }
   0x7   :  { %24 = vsyncpa [#allocation10], 0 }
   0x8   :  { %25 = vsyncpa [#allocation13], 0 }
   0x9   :  { %26 = vsyncpa [#allocation5], 0  ;;  %s1756_s24 = smov [#allocation6]   ;;  %s1757_s26 = smov [#allocation9]  }
   0xa   :  { %s44_s25 = sshll.u32 %s1756_s24, 4  ;;  %s72_s27 = sshll.u32 %s1757_s26, 4  ;;  %s45_s25 = int_to_ptr.vmem [resolvable:$true] %s44_s25  ;;  %s1864_s27 = int_to_ptr.vmem [resolvable:$true] %s72_s27 }
   0xb   :  { %s2165_s0 = sld [smem:[#allocation21_spill]] }
  0x11   :  { %s1592_s30 = scalar_lea.hbm %s2165_s0, 2048 }
  0x12   :  { %p1593_p0 = scmp.ne.s32.totalorder %s2165_s0, %s1592_s30  ;;  %p1596_p1 = scmp.lt.u32.totalorder %s1592_s30, %s2165_s0 }
  0x14   :  { %p1598_p2 = pnand %p1596_p1, %p1593_p0 }
  0x16   :  { %1601 = shalt.err (!%p1598_p2)
}
  0x17   :  { %s1602_s21 = scalar_lea.vmem %s45_s25, 2048  ;;  %p1607_p4 = scmp.lt.s32.totalorder %s45_s25, %s45_s25 }
  0x18   :  { %p1603_p3 = scmp.ne.s32.totalorder %s45_s25, %s1602_s21  ;;  %p1608_p5 = scmp.lt.s32.totalorder %s1602_s21, %s1602_s21 }
  0x1a   :  { %p1609_p6 = por %p1608_p5, %p1607_p4 }
  0x1c   :  { %p1610_p7 = pnand %p1609_p6, %p1603_p3 }
  0x1e   :  { %1613 = shalt.err (!%p1610_p7)
}
  0x1f   :  { %s1758_s22 = smov 128   ;;  %s1759_s23 = smov 8  }
  0x20   :  { %50 = dma.hbm_to_vmem [thread:$0]  %s2165_s0, 2048, %s45_s25, [#allocation7], %s1758_s22, %s1758_s22, %s1759_s23  }
  0x21   :  { %s1614_s30 = scalar_lea.hbm %s2145_s5, 2048 }
  0x22   :  { %p1615_p8 = scmp.ne.s32.totalorder %s2145_s5, %s1614_s30  ;;  %p1618_p9 = scmp.lt.u32.totalorder %s1614_s30, %s2145_s5 }
  0x24   :  { %p1620_p10 = pnand %p1618_p9, %p1615_p8 }
  0x26   :  { %1623 = shalt.err (!%p1620_p10)
}
  0x27   :  { %s1624_s21 = scalar_lea.vmem %s1864_s27, 2048  ;;  %p1629_p12 = scmp.lt.s32.totalorder %s1864_s27, %s1864_s27 }
  0x28   :  { %p1625_p11 = scmp.ne.s32.totalorder %s1864_s27, %s1624_s21  ;;  %p1630_p13 = scmp.lt.s32.totalorder %s1624_s21, %s1624_s21 }
  0x2a   :  { %p1631_p0 = por %p1630_p13, %p1629_p12 }
  0x2c   :  { %p1632_p1 = pnand %p1631_p0, %p1625_p11 }
  0x2e   :  { %1635 = shalt.err (!%p1632_p1)
}
  0x2f   :  { %78 = dma.hbm_to_vmem [thread:$0]  %s2145_s5, 2048, %s1864_s27, [#allocation10], %s1758_s22, %s1758_s22, %s1759_s23  }
  0x30   :  { %s1760_s24 = smov [#allocation3]   ;;  %s1761_s28 = smov [#allocation8]  }
  0x31   :  { %s32_s26 = sshll.u32 %s1760_s24, 4  ;;  %s58_s29 = sshll.u32 %s1761_s28, 4  ;;  %s33_s26 = int_to_ptr.vmem [resolvable:$true] %s32_s26  ;;  %s1901_s29 = int_to_ptr.vmem [resolvable:$true] %s58_s29 }
  0x32   :  { %s2166_s19 = sld [smem:[#allocation20_spill]] }
  0x38   :  { %s1636_s1 = scalar_lea.hbm %s2166_s19, 256 }
  0x39   :  { %p1637_p2 = scmp.ne.s32.totalorder %s2166_s19, %s1636_s1  ;;  %p1640_p3 = scmp.lt.u32.totalorder %s1636_s1, %s2166_s19 }
  0x3b   :  { %p1642_p4 = pnand %p1640_p3, %p1637_p2 }
  0x3d   :  { %1645 = shalt.err (!%p1642_p4)
}
  0x3e   :  { %s1646_s5 = scalar_lea.vmem %s33_s26, 256  ;;  %p1651_p6 = scmp.lt.s32.totalorder %s33_s26, %s33_s26 }
  0x3f   :  { %p1647_p5 = scmp.ne.s32.totalorder %s33_s26, %s1646_s5  ;;  %p1652_p7 = scmp.lt.s32.totalorder %s1646_s5, %s1646_s5 }
  0x41   :  { %p1653_p8 = por %p1652_p7, %p1651_p6 }
  0x43   :  { %p1654_p9 = pnand %p1653_p8, %p1647_p5 }
  0x45   :  { %1657 = shalt.err (!%p1654_p9)
}
  0x46   :  { %38 = dma.hbm_to_vmem [thread:$0]  %s2166_s19, 256, %s33_s26, [#allocation4], %s1758_s22, %s1758_s22, %s1759_s23  }
  0x47   :  { %s1658_s16 = scalar_lea.hbm %s2143_s3, 4096 }
  0x48   :  { %p1659_p10 = scmp.ne.s32.totalorder %s2143_s3, %s1658_s16  ;;  %p1662_p11 = scmp.lt.u32.totalorder %s1658_s16, %s2143_s3 }
  0x4a   :  { %p1664_p12 = pnand %p1662_p11, %p1659_p10 }
  0x4c   :  { %1667 = shalt.err (!%p1664_p12)
}
  0x4d   :  { %s1668_s1 = scalar_lea.vmem %s1901_s29, 4096  ;;  %p1673_p0 = scmp.lt.s32.totalorder %s1901_s29, %s1901_s29 }
  0x4e   :  { %p1669_p13 = scmp.ne.s32.totalorder %s1901_s29, %s1668_s1  ;;  %p1674_p1 = scmp.lt.s32.totalorder %s1668_s1, %s1668_s1 }
  0x50   :  { %p1675_p2 = por %p1674_p1, %p1673_p0 }
  0x52   :  { %p1676_p3 = pnand %p1675_p2, %p1669_p13 }
  0x54   :  { %1679 = shalt.err (!%p1676_p3)
}
  0x55   :  { %s1762_s26 = smov 256   ;;  %s1763_s19 = smov 16  }
  0x56   :  { %64 = dma.hbm_to_vmem [thread:$0]  %s2143_s3, 4096, %s1901_s29, [#allocation7], %s1762_s26, %s1762_s26, %s1763_s19  }
  0x57   :  { %s1764_s5 = smov [#allocation11]   ;;  %s1765_s25 = smov [#allocation12]  }
  0x58   :  { %s94_s27 = sshll.u32 %s1764_s5, 4  ;;  %s108_s0 = sshll.u32 %s1765_s25, 4  ;;  %s95_s27 = int_to_ptr.vmem [resolvable:$true] %s94_s27  ;;  %s1935_s0 = int_to_ptr.vmem [resolvable:$true] %s108_s0 }
  0x59   :  { %s1680_s17 = scalar_lea.hbm %s2151_s11, 4096 }
  0x5a   :  { %p1681_p4 = scmp.ne.s32.totalorder %s2151_s11, %s1680_s17  ;;  %p1684_p5 = scmp.lt.u32.totalorder %s1680_s17, %s2151_s11 }
  0x5c   :  { %p1686_p6 = pnand %p1684_p5, %p1681_p4 }
  0x5e   :  { %1689 = shalt.err (!%p1686_p6)
}
  0x5f   :  { %s1690_s3 = scalar_lea.vmem %s95_s27, 4096  ;;  %p1695_p8 = scmp.lt.s32.totalorder %s95_s27, %s95_s27 }
  0x60   :  { %p1691_p7 = scmp.ne.s32.totalorder %s95_s27, %s1690_s3  ;;  %p1696_p9 = scmp.lt.s32.totalorder %s1690_s3, %s1690_s3 }
  0x62   :  { %p1697_p10 = por %p1696_p9, %p1695_p8 }
  0x64   :  { %p1698_p11 = pnand %p1697_p10, %p1691_p7 }
  0x66   :  { %1701 = shalt.err (!%p1698_p11)
}
  0x67   :  { %100 = dma.hbm_to_vmem [thread:$0]  %s2151_s11, 4096, %s95_s27, [#allocation10], %s1762_s26, %s1762_s26, %s1763_s19  }
  0x68   :  { %s1702_s25 = scalar_lea.hbm %s2153_s13, 4096 }
  0x69   :  { %p1703_p12 = scmp.ne.s32.totalorder %s2153_s13, %s1702_s25  ;;  %p1706_p13 = scmp.lt.u32.totalorder %s1702_s25, %s2153_s13 }
  0x6b   :  { %p1708_p0 = pnand %p1706_p13, %p1703_p12 }
  0x6d   :  { %1711 = shalt.err (!%p1708_p0)
}
  0x6e   :  { %s1712_s30 = scalar_lea.vmem %s1935_s0, 4096  ;;  %p1717_p2 = scmp.lt.s32.totalorder %s1935_s0, %s1935_s0 }
  0x6f   :  { %p1713_p1 = scmp.ne.s32.totalorder %s1935_s0, %s1712_s30  ;;  %p1718_p3 = scmp.lt.s32.totalorder %s1712_s30, %s1712_s30 }
  0x71   :  { %p1719_p4 = por %p1718_p3, %p1717_p2 }
  0x73   :  { %p1720_p5 = pnand %p1719_p4, %p1713_p1 }
  0x75   :  { %1723 = shalt.err (!%p1720_p5)
}
  0x76   :  { %114 = dma.hbm_to_vmem [thread:$0]  %s2153_s13, 4096, %s1935_s0, [#allocation13], %s1758_s22, %s1758_s22, %s1759_s23  }
  0x77   :  { %1746 = dma.done.wait [#allocation4], 256  }
  0x78   :  { %1747 = vsyncadd [#allocation4], 4294967040 }
  0x79   :  { %1748 = dma.done.wait [#allocation7], 6144  }
  0x7a   :  { %1749 = vsyncadd [#allocation7], 4294961152 }
  0x7b   :  { %1750 = dma.done.wait [#allocation10], 6144  }
  0x7c   :  { %1751 = vsyncadd [#allocation10], 4294961152 }
  0x7d   :  { %1752 = dma.done.wait [#allocation13], 4096  }
  0x7e   :  { %1753 = vsyncadd [#allocation13], 4294963200  ;;  %v1969_v0 = vld [vmem:[#allocation3 + $0x8] sm:$0xff]  ;;  %v1972_v1 = vld [vmem:[#allocation3] sm:$0xff]  ;;  %v1766_v7 = vmov 0.0|0.0   ;;  %v1767_v60 = vmov 0.0  }
  0x7f   :  { %145 = vadd.xlane.f32.xlu0 %v1969_v0  ;;  %v183_v2 = vld [vmem:[#allocation8 + $0x8] sm:$0xff]  ;;  %v185_v3 = vld [vmem:[#allocation8 + $0x18] sm:$0xff]  ;;  %v182_v4 = vld [vmem:[#allocation8] sm:$0xff]  ;;  %1414 = vmatprep.subr.bf16.mxu1 %v1766_v7  ;;  %vm1768_vm0 = vmmov 0   ;;  %vm333_vm1 = vcmask 1041409   ;;  %s1772_s18 = smov 32  }
  0x80   :  { %v1382_v5 = vpack.c.bf16 %v185_v3, %v183_v2  ;;  %v184_v6 = vld [vmem:[#allocation8 + $0x10] sm:$0xff]  ;;  %v307_v8 = vld [vmem:[#allocation6] sm:$0xff]  ;;  %v308_v9 = vld [vmem:[#allocation6 + $0x8] sm:$0xff]  ;;  %290 = vmatprep.mubr.f32.mxu0 %v1767_v60  ;;  %1344 = vmatprep.mubr.msk.f32.mxu1 %vm1768_vm0, %v1767_v60  ;;  %vm446_vm2 = vcmask 261120   ;;  %vm553_vm3 = vcmask 523520   ;;  %vm616_vm4 = vcmask 785920  }
  0x81   :  { %v1384_v10 = vpack.c.bf16 %v184_v6, %v182_v4  ;;  %v1415_v11 = vpack.c.bf16 %v308_v9, %v307_v8  ;;  %v187_v12 = vld [vmem:[#allocation8 + $0x28] sm:$0xff]  ;;  %v189_v13 = vld [vmem:[#allocation8 + $0x38] sm:$0xff]  ;;  %v186_v14 = vld [vmem:[#allocation8 + $0x20] sm:$0xff]  ;;  %vm679_vm5 = vcmask 1048320   ;;  %vm711_vm6 = vcmask 523264   ;;  %s2167_s17 = sld [smem:[#allocation22_spill]] }
  0x82   :  { %1383 = vmatprep.subr.bf16.mxu0 %v1382_v5  ;;  %v1386_v15 = vpack.c.bf16 %v189_v13, %v187_v12  ;;  %v188_v16 = vld [vmem:[#allocation8 + $0x30] sm:$0xff]  ;;  %v310_v18 = vld [vmem:[#allocation6 + $0x18] sm:$0xff]  ;;  %v191_v29 = vld [vmem:[#allocation8 + $0x48] sm:$0xff]  ;;  %vm713_vm7 = vcmask 785408   ;;  %vm823_vm8 = vcmask 1041408   ;;  %s1773_s28 = smov [#allocation14]  }
  0x83   :  { %143 = vadd.xlane.f32.xlu0 %v1972_v1  ;;  %v309_v17 = vld [vmem:[#allocation6 + $0x10] sm:$0xff]  ;;  %1385 = vmatpush1.bf16.msra.mxu0 %v1384_v10  ;;  %v1388_v19 = vpack.c.bf16 %v188_v16, %v186_v14  ;;  %v193_v30 = vld [vmem:[#allocation8 + $0x58] sm:$0xff]  ;;  %v190_v32 = vld [vmem:[#allocation8 + $0x40] sm:$0xff]  ;;  %s1222_s30 = sshll.u32 %s1773_s28, 4  ;;  %s1223_s30 = int_to_ptr.vmem [resolvable:$true] %s1222_s30 }
  0x84   :  { %1416 = vmatpush3.bf16.msra.mxu1 %v1415_v11  ;;  %v1418_v20 = vpack.c.bf16 %v310_v18, %v309_v17  ;;  %1387 = vmatprep.subr.bf16.mxu0 %v1386_v15  ;;  %v1390_v31 = vpack.c.bf16 %v193_v30, %v191_v29  ;;  %v192_v33 = vld [vmem:[#allocation8 + $0x50] sm:$0xff]  ;;  %v311_v35 = vld [vmem:[#allocation6 + $0x20] sm:$0xff]  ;;  %v312_v36 = vld [vmem:[#allocation6 + $0x28] sm:$0xff]  ;;  %s1724_s11 = scalar_lea.vmem %s1223_s30, 32  ;;  %p1729_p7 = scmp.lt.s32.totalorder %s1223_s30, %s1223_s30 }
  0x85   :  { %1417 = vmatprep.subr.bf16.mxu1 %v1766_v7  ;;  %v1392_v34 = vpack.c.bf16 %v192_v33, %v190_v32  ;;  %v1421_v37 = vpack.c.bf16 %v312_v36, %v311_v35  ;;  %v195_v38 = vld [vmem:[#allocation8 + $0x68] sm:$0xff]  ;;  %v197_v39 = vld [vmem:[#allocation8 + $0x78] sm:$0xff]  ;;  %v194_v41 = vld [vmem:[#allocation8 + $0x60] sm:$0xff]  ;;  %p1725_p6 = scmp.ne.s32.totalorder %s1223_s30, %s1724_s11  ;;  %p1730_p8 = scmp.lt.s32.totalorder %s1724_s11, %s1724_s11 }
  0x86   :  { %v1394_v40 = vpack.c.bf16 %v197_v39, %v195_v38  ;;  %v196_v42 = vld [vmem:[#allocation8 + $0x70] sm:$0xff]  ;;  %v314_v45 = vld [vmem:[#allocation6 + $0x38] sm:$0xff]  ;;  %v199_v47 = vld [vmem:[#allocation8 + $0x88] sm:$0xff] }
  0x87   :  { %1389 = vmatpush1.bf16.msra.mxu0 %v1388_v19  ;;  %v1396_v43 = vpack.c.bf16 %v196_v42, %v194_v41  ;;  %v313_v44 = vld [vmem:[#allocation6 + $0x30] sm:$0xff]  ;;  %v201_v48 = vld [vmem:[#allocation8 + $0x98] sm:$0xff]  ;;  %v198_v50 = vld [vmem:[#allocation8 + $0x80] sm:$0xff]  ;;  %p1731_p9 = por %p1730_p8, %p1729_p7 }
  0x88   :  { %1419 = vmatpush3.bf16.msra.mxu1 %v1418_v20  ;;  %1391 = vmatprep.subr.bf16.mxu0 %v1390_v31  ;;  %v1424_v46 = vpack.c.bf16 %v314_v45, %v313_v44  ;;  %v1398_v49 = vpack.c.bf16 %v201_v48, %v199_v47  ;;  %v200_v51 = vld [vmem:[#allocation8 + $0x90] sm:$0xff]  ;;  %v315_v53 = vld [vmem:[#allocation6 + $0x40] sm:$0xff]  ;;  %v316_v54 = vld [vmem:[#allocation6 + $0x48] sm:$0xff] }
  0x89   :  { %1420 = vmatprep.subr.bf16.mxu1 %v1766_v7  ;;  %v1400_v52 = vpack.c.bf16 %v200_v51, %v198_v50  ;;  %v203_v55 = vld [vmem:[#allocation8 + $0xa8] sm:$0xff]  ;;  %v1427_v56 = vpack.c.bf16 %v316_v54, %v315_v53  ;;  %v205_v57 = vld [vmem:[#allocation8 + $0xb8] sm:$0xff]  ;;  %v202_v58 = vld [vmem:[#allocation8 + $0xa0] sm:$0xff]  ;;  %p1732_p10 = pnand %p1731_p9, %p1725_p6 }
  0x8a   :  { %v204_v59 = vld [vmem:[#allocation8 + $0xb0] sm:$0xff]  ;;  %v1402_v61 = vpack.c.bf16 %v205_v57, %v203_v55  ;;  %v318_v2 = vld [vmem:[#allocation6 + $0x58] sm:$0xff]  ;;  %v207_v3 = vld [vmem:[#allocation8 + $0xc8] sm:$0xff] }
  0x8b   :  { %1393 = vmatpush1.bf16.msra.mxu0 %v1392_v34  ;;  %v1404_v62 = vpack.c.bf16 %v204_v59, %v202_v58  ;;  %v317_v63 = vld [vmem:[#allocation6 + $0x50] sm:$0xff]  ;;  %v209_v5 = vld [vmem:[#allocation8 + $0xd8] sm:$0xff]  ;;  %v206_v6 = vld [vmem:[#allocation8 + $0xc0] sm:$0xff] }
  0x8c   :  { %1422 = vmatpush3.bf16.msra.mxu1 %v1421_v37  ;;  %1395 = vmatprep.subr.bf16.mxu0 %v1394_v40  ;;  %v1430_v4 = vpack.c.bf16 %v318_v2, %v317_v63  ;;  %v208_v8 = vld [vmem:[#allocation8 + $0xd0] sm:$0xff]  ;;  %v1406_v9 = vpack.c.bf16 %v209_v5, %v207_v3  ;;  %v319_v10 = vld [vmem:[#allocation6 + $0x60] sm:$0xff]  ;;  %v320_v11 = vld [vmem:[#allocation6 + $0x68] sm:$0xff] }
  0x8d   :  { %1423 = vmatprep.subr.bf16.mxu1 %v1766_v7  ;;  %v211_v12 = vld [vmem:[#allocation8 + $0xe8] sm:$0xff]  ;;  %v213_v13 = vld [vmem:[#allocation8 + $0xf8] sm:$0xff]  ;;  %v1408_v14 = vpack.c.bf16 %v208_v8, %v206_v6  ;;  %v1433_v15 = vpack.c.bf16 %v320_v11, %v319_v10  ;;  %v210_v17 = vld [vmem:[#allocation8 + $0xe0] sm:$0xff] }
  0x8e   :  { %v1410_v16 = vpack.c.bf16 %v213_v13, %v211_v12  ;;  %v212_v18 = vld [vmem:[#allocation8 + $0xf0] sm:$0xff]  ;;  %v322_v20 = vld [vmem:[#allocation6 + $0x78] sm:$0xff] }
  0x8f   :  { %1397 = vmatpush1.bf16.msra.mxu0 %v1396_v43  ;;  %v321_v19 = vld [vmem:[#allocation6 + $0x70] sm:$0xff]  ;;  %v1769_v43 = vmov 1966171168  }
  0x90   :  { %1425 = vmatpush3.bf16.msra.mxu1 %v1424_v46  ;;  %1399 = vmatprep.subr.bf16.mxu0 %v1398_v49  ;;  %v1234_v32 = vld [vmem:[%s2147_s7] ss:$0 sm:$0xff] }
  0x91   :  { %1426 = vmatprep.subr.bf16.mxu1 %v1766_v7  ;;  %v1235_v34 = vld [vmem:[%s2148_s8] ss:$0 sm:$0xff] }
  0x92   :  { %v1236_v46 = vld [vmem:[%s2142_s2] ss:$0 sm:$0xff]  ;;  %s1770_s2 = smov 64  }
  0x93   :  { %1401 = vmatpush1.bf16.msra.mxu0 %v1400_v52  ;;  %v2024_v54 = vld [vmem:[%s2144_s4] sm:$0x3]  ;;  %s1771_s4 = smov 96  }
  0x94   :  { %1428 = vmatpush3.bf16.msra.mxu1 %v1427_v56  ;;  %1403 = vmatprep.subr.bf16.mxu0 %v1402_v61 }
  0x95   :  { %1429 = vmatprep.subr.bf16.mxu1 %v1766_v7 }
  0x97   :  { %1405 = vmatpush1.bf16.msra.mxu0 %v1404_v62 }
  0x98   :  { %1431 = vmatpush3.bf16.msra.mxu1 %v1430_v4  ;;  %1407 = vmatprep.subr.bf16.mxu0 %v1406_v9 }
  0x99   :  { %1432 = vmatprep.subr.bf16.mxu1 %v1766_v7 }
  0x9b   :  { %1409 = vmatpush1.bf16.msra.mxu0 %v1408_v14 }
  0x9c   :  { %1434 = vmatpush3.bf16.msra.mxu1 %v1433_v15  ;;  %1411 = vmatprep.subr.bf16.mxu0 %v1410_v16 }
  0x9d   :  { %1435 = vmatprep.subr.bf16.mxu1 %v1766_v7 }
 0x10c   :  { %v146_v21 = vpop.xlane.xlu0 %145 }
 0x10d   :  { %v149_v22 = vmul.f32 0.0078125, %v146_v21  ;;  %v1412_v21 = vpack.c.bf16 %v212_v18, %v210_v17 }
 0x10f   :  { %v1979_v23 = vsub.f32 %v1969_v0, %v149_v22  ;;  %v1436_v22 = vpack.c.bf16 %v322_v20, %v321_v19  ;;  %1413 = vmatpush1.bf16.msra.mxu0 %v1412_v21 }
 0x110   :  { %v144_v24 = vpop.xlane.xlu0 %143  ;;  %1438 = vmatprep.subr.bf16.mxu0 %v1766_v7 }
 0x111   :  { %v148_v25 = vmul.f32 0.0078125, %v144_v24  ;;  %v153_v26 = vmul.f32 %v1979_v23, %v1979_v23  ;;  %1437 = vmatpush3.bf16.msra.mxu1 %v1436_v22 }
 0x113   :  { %v1984_v27 = vsub.f32 %v1972_v1, %v148_v25  ;;  %156 = vadd.xlane.f32.xlu1 %v153_v26 }
 0x115   :  { %v152_v28 = vmul.f32 %v1984_v27, %v1984_v27 }
 0x117   :  { %154 = vadd.xlane.f32.xlu1 %v152_v28 }
 0x1a0   :  { %v157_v24 = vpop.xlane.xlu1 %156 }
 0x1a1   :  { %v159_v25 = vmul.f32 0.0078125, %v157_v24 }
 0x1a3   :  { %v161_v26 = vadd.f32 1e-06, %v159_v25 }
 0x1a4   :  { %v155_v28 = vpop.xlane.xlu1 %154 }
 0x1a5   :  { %1544 = vrsqrt.f32 %v161_v26  ;;  %v158_v29 = vmul.f32 0.0078125, %v155_v28  ;;  %v715_v26 = vld [vmem:[#allocation9] sm:$0xff]  ;;  %v716_v28 = vld [vmem:[#allocation9 + $0x8] sm:$0xff] }
 0x1a7   :  { %v160_v30 = vadd.f32 1e-06, %v158_v29  ;;  %v717_v29 = vld [vmem:[#allocation9 + $0x10] sm:$0xff] }
 0x1a9   :  { %1546 = vrsqrt.f32 %v160_v30  ;;  %v1439_v30 = vpack.c.bf16 %v716_v28, %v715_v26 }
 0x1af   :  { %v1545_v31 = vpop.eup %1544 }
 0x1b0   :  { %v165_v33 = vmul.f32 %v1545_v31, %v1979_v23  ;;  %v216_v23 = vlaneseq  ;;  %v718_v31 = vld [vmem:[#allocation9 + $0x18] sm:$0xff] }
 0x1b2   :  { %v173_v35 = vmul.f32 %v1234_v32, %v165_v33  ;;  %v2010_v44 = vshrl.u32 %v216_v23, 7  ;;  %v1442_v33 = vpack.c.bf16 %v718_v31, %v717_v29 }
 0x1b3   :  { %v1547_v36 = vpop.eup %1546 }
 0x1b4   :  { %v164_v37 = vmul.f32 %v1547_v36, %v1984_v27  ;;  %v181_v38 = vadd.f32 %v1235_v34, %v173_v35  ;;  %v413_v27 = vunpack.c.l.s4 %v1769_v43  ;;  %v2018_v50 = vsub.s32 0, %v2010_v44  ;;  %v719_v35 = vld [vmem:[#allocation9 + $0x20] sm:$0xff]  ;;  %v720_v36 = vld [vmem:[#allocation9 + $0x28] sm:$0xff] }
 0x1b6   :  { %v172_v39 = vmul.f32 %v1234_v32, %v164_v37  ;;  %v332_v41 = vrot.slane %v181_v38, 7  ;;  %v414_v45 = vunpack.c.0.s8 %v413_v27  ;;  %v219_v58 = vrot.slane %v2024_v54, %v2018_v50 }
 0x1b8   :  { %v180_v40 = vadd.f32 %v1235_v34, %v172_v39  ;;  %v417_v52 = vsub.s32 %v414_v45, %v2010_v44 }
 0x1ba   :  { %291 = vmatmul.mubr.f32.vlgmr.msra.gmra.mrb[0].mxu0 %v180_v40  ;;  %v334_v42 = vsel %vm333_vm1, %v332_v41, %v180_v40  ;;  %v721_v40 = vld [vmem:[#allocation9 + $0x30] sm:$0xff]  ;;  %v722_v41 = vld [vmem:[#allocation9 + $0x38] sm:$0xff] }
 0x1bb   :  { %1345 = vmatmul.mubr.f32.vlgmr.msra.gmra.mrb[0].mxu1 %v334_v42  ;;  %296 = vmatprep.mubr.f32.mxu0 %v1767_v60  ;;  %v1448_v27 = vpack.c.bf16 %v722_v41, %v721_v40 }
 0x1bc   :  { %982 = vmatprep.mubr.f32.mxu1 %v1767_v60  ;;  %1440 = vmatpush3.bf16.msra.mxu0 %v1439_v30 }
 0x1bd   :  { %1441 = vmatprep.subr.bf16.mxu0 %v1766_v7 }
 0x1be   :  { %297 = vmatmul.mubr.f32.gmra.mrb[2].mxu0 %v181_v38  ;;  %v1445_v38 = vpack.c.bf16 %v720_v36, %v719_v35 }
 0x1bf   :  { %1379 = vmatprep.mubr.msk.f32.mxu0 %vm1768_vm0, %v1767_v60 }
 0x1c0   :  { %1443 = vmatpush3.bf16.msra.mxu0 %v1442_v33 }
 0x1c1   :  { %1444 = vmatprep.subr.bf16.mxu0 %v1766_v7 }
 0x1c4   :  { %1446 = vmatpush3.bf16.msra.mxu0 %v1445_v38 }
 0x1c5   :  { %1447 = vmatprep.subr.bf16.mxu0 %v1766_v7 }
 0x1c8   :  { %1449 = vmatpush3.bf16.msra.mxu0 %v1448_v27 }
 0x1c9   :  { %1450 = vmatprep.subr.bf16.mxu0 %v1766_v7 }
 0x28d   :  { %v292_v47 = vpop.f32.mrb[0].mxu0 }
 0x28e   :  { %v2015_v48 = vpop.f32.mrb[1].mxu0  ;;  %v402_v49 = vpop.f32.mrb[0].mxu1  ;;  %v293_v62 = vadd.f32 %v292_v47, %v219_v58  ;;  %v724_v47 = vld [vmem:[#allocation9 + $0x48] sm:$0xff] }
 0x28f   :  { %v403_v51 = vadd.f32 %v1236_v46, %v402_v49  ;;  %v1346_v53 = vpop.f32.mrb[1].mxu1  ;;  %v723_v46 = vld [vmem:[#allocation9 + $0x40] sm:$0xff] }
 0x290   :  { %v725_v53 = vld [vmem:[#allocation9 + $0x50] sm:$0xff] }
 0x291   :  { %v406_v55 = vmul.f32 0.17677669, %v403_v51  ;;  %v298_v56 = vpop.f32.mrb[2].mxu0 }
 0x292   :  { %v2026_v57 = vpop.f32.mrb[3].mxu0  ;;  %v299_v3 = vadd.f32 %v298_v56, %v219_v58 }
 0x293   :  { %v418_v59 = vrot.slane %v406_v55, %v417_v52  ;;  %v726_v55 = vld [vmem:[#allocation9 + $0x58] sm:$0xff] }
 0x295   :  { %v419_v60 = vcombine.high %v418_v59, %v418_v59  ;;  %v426_v61 = vrot.slane %v418_v59, %v417_v52  ;;  %v1454_v59 = vpack.c.bf16 %v726_v55, %v725_v53 }
 0x297   :  { %v437_v63 = vrot.slane %v426_v61, %v2018_v50  ;;  %v433_v2 = vrot.slane %v419_v60, %v417_v52  ;;  %v1451_v52 = vpack.c.bf16 %v724_v47, %v723_v46  ;;  %v727_v60 = vld [vmem:[#allocation9 + $0x60] sm:$0xff]  ;;  %v728_v61 = vld [vmem:[#allocation9 + $0x68] sm:$0xff] }
 0x299   :  { %v441_v4 = vrot.slane %v433_v2, %v2018_v50  ;;  %v444_v5 = vmul.f32 %v437_v63, %v293_v62  ;;  %1452 = vmatpush3.bf16.msra.mxu0 %v1451_v52  ;;  %v1457_v2 = vpack.c.bf16 %v728_v61, %v727_v60 }
 0x29a   :  { %1453 = vmatprep.subr.bf16.mxu0 %v1766_v7 }
 0x29b   :  { %v445_v6 = vmul.f32 %v441_v4, %v299_v3  ;;  %568 = vrot.lane.b32.xlu1 %v444_v5, %s1770_s2  ;;  %505 = vrot.lane.b32.xlu0 %v444_v5, %s1771_s4  ;;  %v447_v8 = vsel %vm446_vm2, %v444_v5, 0.0  ;;  %v729_v4 = vld [vmem:[#allocation9 + $0x70] sm:$0xff] }
 0x29d   :  { %v450_v9 = vsel %vm446_vm2, %v445_v6, 0.0  ;;  %1455 = vmatpush3.bf16.msra.mxu0 %v1454_v59 }
 0x29e   :  { %1456 = vmatprep.subr.bf16.mxu0 %v1766_v7 }
 0x29f   :  { %507 = vrot.lane.b32.xlu1 %v445_v6, %s1771_s4  ;;  %631 = vrot.lane.b32.xlu0 %v444_v5, %s1772_s18  ;;  %v730_v5 = vld [vmem:[#allocation9 + $0x78] sm:$0xff] }
 0x2a1   :  { %1458 = vmatpush3.bf16.msra.mxu0 %v1457_v2 }
 0x2a2   :  { %1459 = vmatprep.subr.bf16.mxu0 %v1766_v7 }
 0x2a3   :  { %570 = vrot.lane.b32.xlu1 %v445_v6, %s1770_s2 }
 0x2a7   :  { %633 = vrot.lane.b32.xlu1 %v445_v6, %s1772_s18 }
 0x2be   :  { %448 = vadd.xlane.f32.xlu0 %v447_v8 }
 0x2cb   :  { %451 = vadd.xlane.f32.xlu1 %v450_v9 }
 0x30d   :  { %v569_v10 = vpop.permute.xlu1 %568  ;;  %v506_v11 = vpop.permute.xlu0 %505 }
 0x30e   :  { %v511_v12 = vsel %vm446_vm2, %v506_v11, 0.0  ;;  %v574_v14 = vsel %vm446_vm2, %v569_v10, 0.0  ;;  %v1460_v10 = vpack.c.bf16 %v730_v5, %v729_v4 }
 0x30f   :  { %512 = vadd.xlane.f32.xlu0 %v511_v12 }
 0x310   :  { %1461 = vmatpush3.bf16.msra.mxu0 %v1460_v10 }
 0x311   :  { %v508_v13 = vpop.permute.xlu1 %507  ;;  %v632_v18 = vpop.permute.xlu0 %631 }
 0x312   :  { %v514_v17 = vsel %vm446_vm2, %v508_v13, 0.0  ;;  %v637_v21 = vsel %vm446_vm2, %v632_v18, 0.0 }
 0x313   :  { %575 = vadd.xlane.f32.xlu0 %v574_v14 }
 0x315   :  { %v571_v15 = vpop.permute.xlu1 %570 }
 0x316   :  { %v577_v16 = vsel %vm446_vm2, %v571_v15, 0.0 }
 0x317   :  { %578 = vadd.xlane.f32.xlu1 %v577_v16  ;;  %515 = vadd.xlane.f32.xlu0 %v514_v17  ;;  %v222_v17 = vsub.s32 1, %v2010_v44 }
 0x319   :  { %v634_v19 = vpop.permute.xlu1 %633 }
 0x31a   :  { %v640_v20 = vsel %vm446_vm2, %v634_v19, 0.0 }
 0x31b   :  { %641 = vadd.xlane.f32.xlu1 %v640_v20  ;;  %638 = vadd.xlane.f32.xlu0 %v637_v21  ;;  %v223_v20 = vrot.slane %v2024_v54, %v222_v17 }
 0x31d   :  { %v2052_v7 = vadd.f32 %v2015_v48, %v223_v20  ;;  %v2057_v33 = vadd.f32 %v2026_v57, %v223_v20 }
 0x34b   :  { %v449_v22 = vpop.xlane.xlu0 %448 }
 0x34c   :  { %v453_v24 = vrot.slane %v449_v22, 4 }
 0x34e   :  { %v454_v25 = vmax.f32 %v449_v22, %v453_v24 }
 0x350   :  { %v455_v32 = vrot.slane %v454_v25, 2 }
 0x352   :  { %v456_v34 = vmax.f32 %v454_v25, %v455_v32 }
 0x354   :  { %v457_v37 = vrot.slane %v456_v34, 1 }
 0x356   :  { %v458_v39 = vmax.f32 %v456_v34, %v457_v37 }
 0x358   :  { %v465_v42 = vsub.f32 %v449_v22, %v458_v39  ;;  %v452_v23 = vpop.xlane.xlu1 %451 }
 0x359   :  { %v459_v43 = vrot.slane %v452_v23, 4 }
 0x35a   :  { %v467_v45 = vmul.f32 1.442695, %v465_v42 }
 0x35b   :  { %v460_v49 = vmax.f32 %v452_v23, %v459_v43 }
 0x35c   :  { %1548 = vpow2.f32 %v467_v45 }
 0x35d   :  { %v461_v51 = vrot.slane %v460_v49, 2 }
 0x35f   :  { %v462_v56 = vmax.f32 %v460_v49, %v461_v51 }
 0x361   :  { %v463_v58 = vrot.slane %v462_v56, 1 }
 0x363   :  { %v464_v62 = vmax.f32 %v462_v56, %v463_v58 }
 0x365   :  { %v466_v63 = vsub.f32 %v452_v23, %v464_v62 }
 0x366   :  { %v1549_v3 = vpop.eup %1548 }
 0x367   :  { %v471_v6 = vrot.slane %v1549_v3, 4  ;;  %v469_v8 = vmul.f32 1.442695, %v466_v63 }
 0x369   :  { %v472_v9 = vadd.f32 %v1549_v3, %v471_v6  ;;  %1550 = vpow2.f32 %v469_v8 }
 0x36b   :  { %v473_v11 = vrot.slane %v472_v9, 2 }
 0x36d   :  { %v474_v12 = vadd.f32 %v473_v11, %v472_v9 }
 0x36f   :  { %v475_v13 = vrot.slane %v474_v12, 1 }
 0x371   :  { %v476_v14 = vadd.f32 %v475_v13, %v474_v12 }
 0x373   :  { %v1551_v15 = vpop.eup %1550  ;;  %1552 = vrcp.f32 %v476_v14 }
 0x374   :  { %v477_v16 = vrot.slane %v1551_v15, 4 }
 0x376   :  { %v478_v18 = vadd.f32 %v1551_v15, %v477_v16 }
 0x378   :  { %v479_v19 = vrot.slane %v478_v18, 2 }
 0x37a   :  { %v480_v21 = vadd.f32 %v479_v19, %v478_v18 }
 0x37c   :  { %v481_v22 = vrot.slane %v480_v21, 1 }
 0x37d   :  { %v1553_v24 = vpop.eup %1552 }
 0x37e   :  { %v482_v25 = vadd.f32 %v481_v22, %v480_v21  ;;  %v485_v26 = vmul.f32 %v1553_v24, %v1549_v3 }
 0x380   :  { %1554 = vrcp.f32 %v482_v25  ;;  %v487_v28 = vmul.f32 %v485_v26, %v2052_v7 }
 0x382   :  { %v489_v29 = vsel %vm446_vm2, %v487_v28, 0.0 }
 0x383   :  { %v490_v30 = vrot.slane %v489_v29, 4 }
 0x385   :  { %v491_v32 = vadd.f32 %v490_v30, %v489_v29 }
 0x387   :  { %v492_v35 = vrot.slane %v491_v32, 2 }
 0x389   :  { %v493_v37 = vadd.f32 %v492_v35, %v491_v32 }
 0x38a   :  { %v1555_v31 = vpop.eup %1554 }
 0x38b   :  { %v486_v54 = vmul.f32 %v1555_v31, %v1551_v15  ;;  %v494_v40 = vrot.slane %v493_v37, 1 }
 0x38d   :  { %v488_v34 = vmul.f32 %v486_v54, %v2057_v33  ;;  %v495_v23 = vadd.f32 %v494_v40, %v493_v37 }
 0x38f   :  { %v496_v48 = vsel %vm446_vm2, %v488_v34, 0.0 }
 0x390   :  { %v497_v36 = vrot.slane %v496_v48, 4 }
 0x392   :  { %v498_v38 = vadd.f32 %v497_v36, %v496_v48 }
 0x394   :  { %v499_v39 = vrot.slane %v498_v38, 2 }
 0x396   :  { %v500_v41 = vadd.f32 %v499_v39, %v498_v38 }
 0x398   :  { %v501_v42 = vrot.slane %v500_v41, 1 }
 0x39a   :  { %v502_v43 = vadd.f32 %v501_v42, %v500_v41 }
 0x39c   :  { %v513_v27 = vpop.xlane.xlu0 %512  ;;  %v2062_v45 = vsel %vm333_vm1, %v502_v43, %v495_v23 }
 0x39d   :  { %v517_v57 = vrot.slane %v513_v27, 4 }
 0x39f   :  { %v518_v46 = vmax.f32 %v513_v27, %v517_v57 }
 0x3a0   :  { %v576_v47 = vpop.xlane.xlu0 %575 }
 0x3a1   :  { %v519_v49 = vrot.slane %v518_v46, 2  ;;  %v580_v51 = vrot.slane %v576_v47, 4 }
 0x3a3   :  { %v520_v52 = vmax.f32 %v518_v46, %v519_v49  ;;  %v581_v53 = vmax.f32 %v576_v47, %v580_v51 }
 0x3a4   :  { %v579_v55 = vpop.xlane.xlu1 %578  ;;  %v516_v56 = vpop.xlane.xlu0 %515 }
 0x3a5   :  { %v521_v58 = vrot.slane %v520_v52, 1  ;;  %v582_v59 = vrot.slane %v581_v53, 2  ;;  %v586_v60 = vrot.slane %v579_v55, 4  ;;  %v523_v61 = vrot.slane %v516_v56, 4 }
 0x3a7   :  { %v522_v62 = vmax.f32 %v520_v52, %v521_v58  ;;  %v583_v63 = vmax.f32 %v581_v53, %v582_v59  ;;  %v587_v2 = vmax.f32 %v579_v55, %v586_v60  ;;  %v524_v3 = vmax.f32 %v516_v56, %v523_v61 }
 0x3a8   :  { %v642_v4 = vpop.xlane.xlu1 %641  ;;  %v639_v5 = vpop.xlane.xlu0 %638 }
 0x3a9   :  { %v529_v6 = vsub.f32 %v513_v27, %v522_v62  ;;  %v584_v8 = vrot.slane %v583_v63, 1  ;;  %v588_v9 = vrot.slane %v587_v2, 2  ;;  %v525_v10 = vrot.slane %v524_v3, 2 }
 0x3aa   :  { %v649_v11 = vrot.slane %v642_v4, 4  ;;  %v643_v12 = vrot.slane %v639_v5, 4 }
 0x3ab   :  { %v531_v13 = vmul.f32 1.442695, %v529_v6  ;;  %v585_v14 = vmax.f32 %v583_v63, %v584_v8  ;;  %v589_v15 = vmax.f32 %v587_v2, %v588_v9  ;;  %v526_v16 = vmax.f32 %v524_v3, %v525_v10 }
 0x3ac   :  { %v650_v18 = vmax.f32 %v642_v4, %v649_v11  ;;  %v644_v19 = vmax.f32 %v639_v5, %v643_v12 }
 0x3ad   :  { %1556 = vpow2.f32 %v531_v13  ;;  %v592_v20 = vsub.f32 %v576_v47, %v585_v14  ;;  %v590_v21 = vrot.slane %v589_v15, 1  ;;  %v527_v22 = vrot.slane %v526_v16, 1 }
 0x3ae   :  { %v651_v24 = vrot.slane %v650_v18, 2  ;;  %v645_v25 = vrot.slane %v644_v19, 2 }
 0x3af   :  { %v594_v26 = vmul.f32 1.442695, %v592_v20  ;;  %v591_v28 = vmax.f32 %v589_v15, %v590_v21  ;;  %v528_v29 = vmax.f32 %v526_v16, %v527_v22 }
 0x3b0   :  { %v652_v30 = vmax.f32 %v650_v18, %v651_v24  ;;  %v646_v31 = vmax.f32 %v644_v19, %v645_v25 }
 0x3b1   :  { %1558 = vpow2.f32 %v594_v26  ;;  %v593_v32 = vsub.f32 %v579_v55, %v591_v28  ;;  %v530_v54 = vsub.f32 %v516_v56, %v528_v29 }
 0x3b2   :  { %v653_v34 = vrot.slane %v652_v30, 1  ;;  %v647_v35 = vrot.slane %v646_v31, 1 }
 0x3b3   :  { %v596_v48 = vmul.f32 1.442695, %v593_v32  ;;  %v533_v36 = vmul.f32 1.442695, %v530_v54 }
 0x3b4   :  { %v654_v37 = vmax.f32 %v652_v30, %v653_v34  ;;  %v648_v38 = vmax.f32 %v646_v31, %v647_v35 }
 0x3b5   :  { %1560 = vpow2.f32 %v596_v48 }
 0x3b6   :  { %1562 = vpow2.f32 %v533_v36  ;;  %v656_v39 = vsub.f32 %v642_v4, %v654_v37  ;;  %v655_v40 = vsub.f32 %v639_v5, %v648_v38 }
 0x3b7   :  { %v1557_v41 = vpop.eup %1556 }
 0x3b8   :  { %v535_v42 = vrot.slane %v1557_v41, 4  ;;  %v659_v23 = vmul.f32 1.442695, %v656_v39  ;;  %v657_v43 = vmul.f32 1.442695, %v655_v40 }
 0x3ba   :  { %v536_v27 = vadd.f32 %v1557_v41, %v535_v42  ;;  %1564 = vpow2.f32 %v659_v23 }
 0x3bb   :  { %v1559_v57 = vpop.eup %1558  ;;  %1566 = vpow2.f32 %v657_v43 }
 0x3bc   :  { %v537_v46 = vrot.slane %v536_v27, 2  ;;  %v598_v47 = vrot.slane %v1559_v57, 4 }
 0x3be   :  { %v538_v49 = vadd.f32 %v537_v46, %v536_v27  ;;  %v599_v51 = vadd.f32 %v1559_v57, %v598_v47 }
 0x3bf   :  { %v1561_v52 = vpop.eup %1560 }
 0x3c0   :  { %v1563_v53 = vpop.eup %1562  ;;  %v539_v55 = vrot.slane %v538_v49, 1  ;;  %v600_v56 = vrot.slane %v599_v51, 2  ;;  %v604_v58 = vrot.slane %v1561_v52, 4 }
 0x3c1   :  { %v541_v59 = vrot.slane %v1563_v53, 4 }
 0x3c2   :  { %v540_v60 = vadd.f32 %v539_v55, %v538_v49  ;;  %v601_v61 = vadd.f32 %v600_v56, %v599_v51  ;;  %v605_v62 = vadd.f32 %v1561_v52, %v604_v58 }
 0x3c3   :  { %v542_v63 = vadd.f32 %v1563_v53, %v541_v59 }
 0x3c4   :  { %v1565_v2 = vpop.eup %1564  ;;  %1568 = vrcp.f32 %v540_v60  ;;  %v602_v3 = vrot.slane %v601_v61, 1  ;;  %v606_v4 = vrot.slane %v605_v62, 2 }
 0x3c5   :  { %v1567_v5 = vpop.eup %1566  ;;  %v543_v6 = vrot.slane %v542_v63, 2  ;;  %v667_v8 = vrot.slane %v1565_v2, 4 }
 0x3c6   :  { %v603_v9 = vadd.f32 %v602_v3, %v601_v61  ;;  %v607_v10 = vadd.f32 %v606_v4, %v605_v62  ;;  %v661_v11 = vrot.slane %v1567_v5, 4 }
 0x3c7   :  { %v544_v12 = vadd.f32 %v543_v6, %v542_v63  ;;  %v668_v13 = vadd.f32 %v1565_v2, %v667_v8 }
 0x3c8   :  { %1570 = vrcp.f32 %v603_v9  ;;  %v608_v14 = vrot.slane %v607_v10, 1  ;;  %v662_v15 = vadd.f32 %v1567_v5, %v661_v11 }
 0x3c9   :  { %v545_v16 = vrot.slane %v544_v12, 1  ;;  %v669_v18 = vrot.slane %v668_v13, 2 }
 0x3ca   :  { %v609_v19 = vadd.f32 %v608_v14, %v607_v10  ;;  %v663_v20 = vrot.slane %v662_v15, 2 }
 0x3cb   :  { %v546_v21 = vadd.f32 %v545_v16, %v544_v12  ;;  %v670_v22 = vadd.f32 %v669_v18, %v668_v13 }
 0x3cc   :  { %1572 = vrcp.f32 %v609_v19  ;;  %v664_v24 = vadd.f32 %v663_v20, %v662_v15 }
 0x3cd   :  { %1574 = vrcp.f32 %v546_v21  ;;  %v671_v25 = vrot.slane %v670_v22, 1 }
 0x3ce   :  { %v1569_v26 = vpop.eup %1568  ;;  %v665_v28 = vrot.slane %v664_v24, 1 }
 0x3cf   :  { %v549_v29 = vmul.f32 %v1569_v26, %v1557_v41  ;;  %v672_v30 = vadd.f32 %v671_v25, %v670_v22 }
 0x3d0   :  { %v666_v31 = vadd.f32 %v665_v28, %v664_v24 }
 0x3d1   :  { %v551_v32 = vmul.f32 %v549_v29, %v2052_v7  ;;  %1576 = vrcp.f32 %v672_v30 }
 0x3d2   :  { %v1571_v54 = vpop.eup %1570  ;;  %1578 = vrcp.f32 %v666_v31 }
 0x3d3   :  { %v554_v34 = vsel %vm553_vm3, %v551_v32, 0.0  ;;  %v612_v35 = vmul.f32 %v1571_v54, %v1559_v57 }
 0x3d4   :  { %v555_v48 = vrot.slane %v554_v34, 4 }
 0x3d5   :  { %v614_v36 = vmul.f32 %v612_v35, %v2052_v7 }
 0x3d6   :  { %v1573_v37 = vpop.eup %1572  ;;  %v556_v39 = vadd.f32 %v555_v48, %v554_v34 }
 0x3d7   :  { %v1575_v38 = vpop.eup %1574  ;;  %v613_v40 = vmul.f32 %v1573_v37, %v1561_v52  ;;  %v617_v41 = vsel %vm616_vm4, %v614_v36, 0.0 }
 0x3d8   :  { %v550_v42 = vmul.f32 %v1575_v38, %v1563_v53  ;;  %v618_v23 = vrot.slane %v617_v41, 4  ;;  %v557_v49 = vrot.slane %v556_v39, 2 }
 0x3d9   :  { %v615_v43 = vmul.f32 %v613_v40, %v2057_v33 }
 0x3da   :  { %v552_v27 = vmul.f32 %v550_v42, %v2057_v33  ;;  %v619_v46 = vadd.f32 %v618_v23, %v617_v41  ;;  %v558_v53 = vadd.f32 %v557_v49, %v556_v39  ;;  %v1237_v42 = vld [vmem:[%s2146_s6] ss:$0 sm:$0xff] }
 0x3db   :  { %v1577_v47 = vpop.eup %1576  ;;  %v624_v51 = vsel %vm616_vm4, %v615_v43, 0.0 }
 0x3dc   :  { %v1579_v57 = vpop.eup %1578  ;;  %v561_v55 = vsel %vm553_vm3, %v552_v27, 0.0  ;;  %v620_v56 = vrot.slane %v619_v46, 2  ;;  %v625_v58 = vrot.slane %v624_v51, 4  ;;  %v676_v61 = vmul.f32 %v1577_v47, %v1565_v2  ;;  %v872_v47 = vld [vmem:[#allocation11 + $0x18] sm:$0xff] }
 0x3dd   :  { %v562_v59 = vrot.slane %v561_v55, 4  ;;  %v675_v60 = vmul.f32 %v1579_v57, %v1567_v5  ;;  %v559_v15 = vrot.slane %v558_v53, 1  ;;  %v874_v57 = vld [vmem:[#allocation11 + $0x28] sm:$0xff] }
 0x3de   :  { %v621_v52 = vadd.f32 %v620_v56, %v619_v46  ;;  %v626_v62 = vadd.f32 %v625_v58, %v624_v51  ;;  %v678_v4 = vmul.f32 %v676_v61, %v2057_v33  ;;  %v871_v51 = vld [vmem:[#allocation11 + $0x10] sm:$0xff] }
 0x3df   :  { %v563_v63 = vadd.f32 %v562_v59, %v561_v55  ;;  %v677_v3 = vmul.f32 %v675_v60, %v2052_v7  ;;  %v560_v24 = vadd.f32 %v559_v15, %v558_v53  ;;  %v876_v55 = vld [vmem:[#allocation11 + $0x38] sm:$0xff]  ;;  %v873_v59 = vld [vmem:[#allocation11 + $0x20] sm:$0xff]  ;;  %v875_v60 = vld [vmem:[#allocation11 + $0x30] sm:$0xff] }
 0x3e0   :  { %v627_v6 = vrot.slane %v626_v62, 2  ;;  %v687_v10 = vsel %vm679_vm5, %v678_v4, 0.0  ;;  %v622_v11 = vrot.slane %v621_v52, 1  ;;  %v1466_v58 = vpack.c.bf16 %v876_v55, %v874_v57  ;;  %v879_v15 = vld [vmem:[#allocation11 + $0x50] sm:$0xff] }
 0x3e1   :  { %v564_v8 = vrot.slane %v563_v63, 2  ;;  %v680_v9 = vsel %vm679_vm5, %v677_v3, 0.0  ;;  %v688_v14 = vrot.slane %v687_v10, 4  ;;  %v1468_v61 = vpack.c.bf16 %v875_v60, %v873_v59  ;;  %v1238_v57 = vld [vmem:[%s2149_s9] ss:$0 sm:$0xff] }
 0x3e2   :  { %v628_v12 = vadd.f32 %v627_v6, %v626_v62  ;;  %v681_v13 = vrot.slane %v680_v9, 4  ;;  %v623_v20 = vadd.f32 %v622_v11, %v621_v52  ;;  %v878_v11 = vld [vmem:[#allocation11 + $0x48] sm:$0xff]  ;;  %v1239_v59 = vld [vmem:[%s2150_s10] ss:$0 sm:$0xff] }
 0x3e3   :  { %v565_v5 = vadd.f32 %v564_v8, %v563_v63  ;;  %v689_v18 = vadd.f32 %v688_v14, %v687_v10  ;;  %v877_v14 = vld [vmem:[#allocation11 + $0x40] sm:$0xff] }
 0x3e4   :  { %v629_v2 = vrot.slane %v628_v12, 1  ;;  %v682_v16 = vadd.f32 %v681_v13, %v680_v9 }
 0x3e5   :  { %v566_v19 = vrot.slane %v565_v5, 1  ;;  %v690_v7 = vrot.slane %v689_v18, 2 }
 0x3e6   :  { %v630_v21 = vadd.f32 %v629_v2, %v628_v12  ;;  %v683_v22 = vrot.slane %v682_v16, 2  ;;  %v880_v12 = vld [vmem:[#allocation11 + $0x58] sm:$0xff]  ;;  %v882_v2 = vld [vmem:[#allocation11 + $0x68] sm:$0xff] }
 0x3e7   :  { %v567_v33 = vadd.f32 %v566_v19, %v565_v5  ;;  %v691_v26 = vadd.f32 %v690_v7, %v689_v18  ;;  %v1470_v13 = vpack.c.bf16 %v880_v12, %v878_v11  ;;  %v1472_v5 = vpack.c.bf16 %v879_v15, %v877_v14  ;;  %v881_v19 = vld [vmem:[#allocation11 + $0x60] sm:$0xff]  ;;  %v888_v7 = vld [vmem:[#allocation11 + $0x98] sm:$0xff]  ;;  %v1045_v12 = vld [vmem:[#allocation12 + $0x10] sm:$0xff] }
 0x3e8   :  { %v684_v25 = vadd.f32 %v683_v22, %v682_v16  ;;  %v704_v28 = vsel %vm333_vm1, %v630_v21, %v623_v20  ;;  %v884_v16 = vld [vmem:[#allocation11 + $0x78] sm:$0xff]  ;;  %v883_v20 = vld [vmem:[#allocation11 + $0x70] sm:$0xff]  ;;  %v886_v22 = vld [vmem:[#allocation11 + $0x88] sm:$0xff] }
 0x3e9   :  { %v700_v29 = vsel %vm333_vm1, %v567_v33, %v560_v24  ;;  %v692_v31 = vrot.slane %v691_v26, 1  ;;  %v1474_v18 = vpack.c.bf16 %v884_v16, %v882_v2  ;;  %v1476_v21 = vpack.c.bf16 %v883_v20, %v881_v19  ;;  %v885_v33 = vld [vmem:[#allocation11 + $0x80] sm:$0xff]  ;;  %v1065_v20 = vld [vmem:[#allocation12 + $0xb0] sm:$0xff] }
 0x3ea   :  { %v685_v30 = vrot.slane %v684_v25, 1  ;;  %v710_v32 = vsel %vm446_vm2, %v2062_v45, %v700_v29  ;;  %v1478_v24 = vpack.c.bf16 %v888_v7, %v886_v22  ;;  %v892_v29 = vld [vmem:[#allocation11 + $0xb8] sm:$0xff]  ;;  %v1063_v15 = vld [vmem:[#allocation12 + $0xa0] sm:$0xff]  ;;  %v1049_v7 = vld [vmem:[#allocation12 + $0x30] sm:$0xff] }
 0x3eb   :  { %v712_v54 = vsel %vm711_vm6, %v710_v32, %v704_v28  ;;  %v693_v35 = vadd.f32 %v692_v31, %v691_v26  ;;  %v890_v28 = vld [vmem:[#allocation11 + $0xa8] sm:$0xff]  ;;  %v889_v31 = vld [vmem:[#allocation11 + $0xa0] sm:$0xff]  ;;  %v891_v32 = vld [vmem:[#allocation11 + $0xb0] sm:$0xff] }
 0x3ec   :  { %v686_v34 = vadd.f32 %v685_v30, %v684_v25  ;;  %v887_v25 = vld [vmem:[#allocation11 + $0x90] sm:$0xff]  ;;  %v1482_v30 = vpack.c.bf16 %v892_v29, %v890_v28  ;;  %v1047_v16 = vld [vmem:[#allocation12 + $0x20] sm:$0xff] }
 0x3ed   :  { %v1480_v26 = vpack.c.bf16 %v887_v25, %v885_v33  ;;  %v1067_v25 = vld [vmem:[#allocation12 + $0xc0] sm:$0xff] }
 0x3ee   :  { %v708_v48 = vsel %vm333_vm1, %v693_v35, %v686_v34  ;;  %v894_v34 = vld [vmem:[#allocation11 + $0xc8] sm:$0xff]  ;;  %v896_v35 = vld [vmem:[#allocation11 + $0xd8] sm:$0xff]  ;;  %v1051_v29 = vld [vmem:[#allocation12 + $0x40] sm:$0xff] }
 0x3ef   :  { %v714_v36 = vsel %vm713_vm7, %v712_v54, %v708_v48  ;;  %v1484_v54 = vpack.c.bf16 %v891_v32, %v889_v31  ;;  %v893_v48 = vld [vmem:[#allocation11 + $0xc0] sm:$0xff]  ;;  %v1069_v32 = vld [vmem:[#allocation12 + $0xd0] sm:$0xff] }
 0x3f0   :  { %1380 = vmatmul.mubr.f32.vlgmr.msra.gmra.mrb[4].mxu0 %v714_v36  ;;  %v1486_v36 = vpack.c.bf16 %v896_v35, %v894_v34  ;;  %v1053_v35 = vld [vmem:[#allocation12 + $0x50] sm:$0xff] }
 0x4c3   :  { %v797_v37 = vpop.f32.mrb[4].mxu0 }
 0x4c4   :  { %v802_v38 = vrot.slane %v797_v37, 1  ;;  %v1381_v39 = vpop.f32.mrb[5].mxu0  ;;  %v805_v40 = vadd.f32 %v797_v37, %v1972_v1  ;;  %v870_v1 = vld [vmem:[#allocation11 + $0x8] sm:$0xff]  ;;  %v895_v37 = vld [vmem:[#allocation11 + $0xd0] sm:$0xff] }
 0x4c5   :  { %v1462_v49 = vpack.c.bf16 %v872_v47, %v870_v1  ;;  %v900_v39 = vld [vmem:[#allocation11 + $0xf8] sm:$0xff] }
 0x4c6   :  { %v806_v41 = vadd.f32 %v802_v38, %v1969_v0  ;;  %v2084_v23 = vadd.f32 %v1237_v42, %v805_v40  ;;  %v869_v0 = vld [vmem:[#allocation11] sm:$0xff]  ;;  %v898_v38 = vld [vmem:[#allocation11 + $0xe8] sm:$0xff]  ;;  %v1488_v40 = vpack.c.bf16 %v895_v37, %v893_v48  ;;  %v1054_v48 = vld [vmem:[#allocation12 + $0x58] sm:$0xff] }
 0x4c7   :  { %v1464_v56 = vpack.c.bf16 %v871_v51, %v869_v0  ;;  %1463 = vmatprep.subr.bf16.mxu1 %v1462_v49  ;;  %v1071_v37 = vld [vmem:[#allocation12 + $0xe0] sm:$0xff] }
 0x4c8   :  { %v2082_v45 = vadd.f32 %v1237_v42, %v806_v41  ;;  %v1490_v41 = vpack.c.bf16 %v900_v39, %v898_v38  ;;  %v897_v42 = vld [vmem:[#allocation11 + $0xe0] sm:$0xff]  ;;  %v1072_v38 = vld [vmem:[#allocation12 + $0xe8] sm:$0xff] }
 0x4c9   :  { %1465 = vmatpush1.bf16.msra.mxu1 %v1464_v56  ;;  %v1518_v39 = vpack.c.bf16 %v1072_v38, %v1071_v37 }
 0x4ca   :  { %v820_v43 = vrot.slane %v2082_v45, 7  ;;  %1467 = vmatprep.subr.bf16.mxu1 %v1466_v58 }
 0x4cc   :  { %v821_v27 = vsel %vm333_vm1, %v820_v43, %v2084_v23  ;;  %v899_v43 = vld [vmem:[#allocation11 + $0xf0] sm:$0xff] }
 0x4cd   :  { %v824_v46 = vsel %vm823_vm8, %v821_v27, 0.0  ;;  %1469 = vmatpush1.bf16.msra.mxu1 %v1468_v61  ;;  %v1492_v27 = vpack.c.bf16 %v899_v43, %v897_v42  ;;  %v1073_v43 = vld [vmem:[#allocation12 + $0xf0] sm:$0xff] }
 0x4ce   :  { %825 = vadd.xlane.f32.xlu0 %v824_v46  ;;  %1471 = vmatprep.subr.bf16.mxu1 %v1470_v13  ;;  %v1046_v13 = vld [vmem:[#allocation12 + $0x18] sm:$0xff] }
 0x4cf   :  { %v1500_v14 = vpack.c.bf16 %v1046_v13, %v1045_v12 }
 0x4d1   :  { %1473 = vmatpush1.bf16.msra.mxu1 %v1472_v5  ;;  %v1064_v5 = vld [vmem:[#allocation12 + $0xa8] sm:$0xff] }
 0x4d2   :  { %1475 = vmatprep.subr.bf16.mxu1 %v1474_v18  ;;  %v1502_v2 = vpack.c.bf16 %v1064_v5, %v1063_v15  ;;  %v1048_v18 = vld [vmem:[#allocation12 + $0x28] sm:$0xff] }
 0x4d3   :  { %v1504_v19 = vpack.c.bf16 %v1048_v18, %v1047_v16 }
 0x4d5   :  { %1477 = vmatpush1.bf16.msra.mxu1 %v1476_v21  ;;  %v1066_v21 = vld [vmem:[#allocation12 + $0xb8] sm:$0xff] }
 0x4d6   :  { %1479 = vmatprep.subr.bf16.mxu1 %v1478_v24  ;;  %v1506_v22 = vpack.c.bf16 %v1066_v21, %v1065_v20  ;;  %v1050_v24 = vld [vmem:[#allocation12 + $0x38] sm:$0xff] }
 0x4d7   :  { %v1508_v33 = vpack.c.bf16 %v1050_v24, %v1049_v7 }
 0x4d9   :  { %1481 = vmatpush1.bf16.msra.mxu1 %v1480_v26  ;;  %v1068_v26 = vld [vmem:[#allocation12 + $0xc8] sm:$0xff] }
 0x4da   :  { %1483 = vmatprep.subr.bf16.mxu1 %v1482_v30  ;;  %v1510_v28 = vpack.c.bf16 %v1068_v26, %v1067_v25  ;;  %v1052_v30 = vld [vmem:[#allocation12 + $0x48] sm:$0xff] }
 0x4db   :  { %v1512_v31 = vpack.c.bf16 %v1052_v30, %v1051_v29 }
 0x4dd   :  { %1485 = vmatpush1.bf16.msra.mxu1 %v1484_v54  ;;  %v1070_v54 = vld [vmem:[#allocation12 + $0xd8] sm:$0xff] }
 0x4de   :  { %1487 = vmatprep.subr.bf16.mxu1 %v1486_v36  ;;  %v1514_v34 = vpack.c.bf16 %v1070_v54, %v1069_v32  ;;  %v1516_v36 = vpack.c.bf16 %v1054_v48, %v1053_v35 }
 0x4e1   :  { %1489 = vmatpush1.bf16.msra.mxu1 %v1488_v40  ;;  %v1055_v40 = vld [vmem:[#allocation12 + $0x60] sm:$0xff] }
 0x4e2   :  { %1491 = vmatprep.subr.bf16.mxu1 %v1490_v41  ;;  %v1056_v41 = vld [vmem:[#allocation12 + $0x68] sm:$0xff] }
 0x4e3   :  { %v1520_v42 = vpack.c.bf16 %v1056_v41, %v1055_v40 }
 0x4e5   :  { %1493 = vmatpush1.bf16.msra.mxu1 %v1492_v27  ;;  %v1074_v27 = vld [vmem:[#allocation12 + $0xf8] sm:$0xff] }
 0x55b   :  { %v826_v52 = vpop.xlane.xlu0 %825 }
 0x55c   :  { %v827_v62 = vmul.f32 0.0078125, %v826_v52 }
 0x55e   :  { %v829_v53 = vrot.slane %v827_v62, 1  ;;  %v832_v63 = vsub.f32 %v2084_v23, %v827_v62 }
 0x560   :  { %v2092_v3 = vsub.f32 %v2082_v45, %v829_v53  ;;  %v834_v6 = vmul.f32 %v832_v63, %v832_v63  ;;  %v1059_v53 = vld [vmem:[#allocation12 + $0x80] sm:$0xff] }
 0x562   :  { %v835_v4 = vmul.f32 %v2092_v3, %v2092_v3 }
 0x564   :  { %v838_v8 = vrot.slane %v835_v4, 7 }
 0x566   :  { %v839_v9 = vsel %vm333_vm1, %v838_v8, %v834_v6  ;;  %v1043_v6 = vld [vmem:[#allocation12] sm:$0xff]  ;;  %v1044_v8 = vld [vmem:[#allocation12 + $0x8] sm:$0xff] }
 0x567   :  { %v841_v10 = vsel %vm823_vm8, %v839_v9, 0.0  ;;  %v1496_v9 = vpack.c.bf16 %v1044_v8, %v1043_v6 }
 0x568   :  { %842 = vadd.xlane.f32.xlu1 %v841_v10  ;;  %v1062_v10 = vld [vmem:[#allocation12 + $0x98] sm:$0xff] }
 0x5f5   :  { %v843_v46 = vpop.xlane.xlu1 %842 }
 0x5f6   :  { %v844_v1 = vmul.f32 0.0078125, %v843_v46  ;;  %v1522_v46 = vpack.c.bf16 %v1074_v27, %v1073_v43 }
 0x5f8   :  { %v845_v47 = vadd.f32 1e-06, %v844_v1  ;;  %v1057_v1 = vld [vmem:[#allocation12 + $0x70] sm:$0xff] }
 0x5fa   :  { %1580 = vrsqrt.f32 %v845_v47  ;;  %v1058_v47 = vld [vmem:[#allocation12 + $0x78] sm:$0xff] }
 0x604   :  { %v1581_v0 = vpop.eup %1580 }
 0x605   :  { %v848_v49 = vrot.slane %v1581_v0, 1  ;;  %v851_v51 = vmul.f32 %v1581_v0, %v832_v63  ;;  %v1060_v63 = vld [vmem:[#allocation12 + $0x88] sm:$0xff]  ;;  %v1524_v0 = vpack.c.bf16 %v1058_v47, %v1057_v1 }
 0x606   :  { %v1494_v4 = vpack.c.bf16 %v1060_v63, %v1059_v53 }
 0x607   :  { %v852_v55 = vmul.f32 %v848_v49, %v2092_v3  ;;  %v859_v56 = vmul.f32 %v1238_v57, %v851_v51  ;;  %v1061_v3 = vld [vmem:[#allocation12 + $0x90] sm:$0xff] }
 0x608   :  { %1495 = vmatprep.subr.bf16.mxu0 %v1494_v4  ;;  %v1498_v11 = vpack.c.bf16 %v1062_v10, %v1061_v3  ;;  %v901_v49 = vld [vmem:[%s2152_s12] sm:$0x3] }
 0x609   :  { %v860_v58 = vmul.f32 %v1238_v57, %v852_v55  ;;  %v867_v61 = vadd.f32 %v1239_v59, %v859_v56  ;;  %1497 = vmatpush3.bf16.msra.mxu0 %v1496_v9  ;;  %v906_v51 = vrot.slane %v901_v49, %v2018_v50  ;;  %v910_v57 = vrot.slane %v901_v49, %v222_v17 }
 0x60a   :  { %1499 = vmatprep.subr.bf16.mxu0 %v1498_v11 }
 0x60b   :  { %v868_v60 = vadd.f32 %v1239_v59, %v860_v58 }
 0x60d   :  { %v915_v52 = vrot.slane %v868_v60, 7  ;;  %1501 = vmatpush3.bf16.msra.mxu0 %v1500_v14 }
 0x60e   :  { %1503 = vmatprep.subr.bf16.mxu0 %v1502_v2 }
 0x60f   :  { %v916_v62 = vsel %vm333_vm1, %v915_v52, %v867_v61 }
 0x610   :  { %983 = vmatmul.mubr.f32.vlgmr.msra.gmra.mrb[2].mxu1 %v916_v62 }
 0x611   :  { %1505 = vmatpush3.bf16.msra.mxu0 %v1504_v19 }
 0x612   :  { %1507 = vmatprep.subr.bf16.mxu0 %v1506_v22 }
 0x615   :  { %1509 = vmatpush3.bf16.msra.mxu0 %v1508_v33 }
 0x616   :  { %1511 = vmatprep.subr.bf16.mxu0 %v1510_v28 }
 0x619   :  { %1513 = vmatpush3.bf16.msra.mxu0 %v1512_v31 }
 0x61a   :  { %1515 = vmatprep.subr.bf16.mxu0 %v1514_v34 }
 0x61d   :  { %1517 = vmatpush3.bf16.msra.mxu0 %v1516_v36 }
 0x61e   :  { %1519 = vmatprep.subr.bf16.mxu0 %v1518_v39 }
 0x621   :  { %1521 = vmatpush3.bf16.msra.mxu0 %v1520_v42 }
 0x622   :  { %1523 = vmatprep.subr.bf16.mxu0 %v1522_v46  ;;  %v1240_v46 = vld [vmem:[%s2154_s14] ss:$0 sm:$0xff] }
 0x625   :  { %1525 = vmatpush3.bf16.msra.mxu0 %v1524_v0 }
 0x6e3   :  { %v984_v55 = vpop.f32.mrb[2].mxu1 }
 0x6e4   :  { %v985_v56 = vadd.f32 %v984_v55, %v906_v51  ;;  %v986_v58 = vpop.f32.mrb[3].mxu1 }
 0x6e5   :  { %v987_v59 = vadd.f32 %v986_v58, %v910_v57 }
 0x6e6   :  { %v991_v60 = vmul.f32 0.70710677, %v985_v56  ;;  %v989_v41 = vmul.f32 0.5, %v985_v56 }
 0x6e7   :  { %v992_v61 = vmul.f32 0.70710677, %v987_v59  ;;  %v990_v39 = vmul.f32 0.5, %v987_v59 }
 0x6e8   :  { %v993_v52 = vand.u32 2147483647, %v991_v60  ;;  %vm1033_vm9 = vcmp.ge.f32.partialorder %v991_v60, 0.0 }
 0x6e9   :  { %v994_v62 = vand.u32 2147483647, %v992_v61  ;;  %vm1034_vm10 = vcmp.ge.f32.partialorder %v992_v61, 0.0 }
 0x6ea   :  { %v995_v53 = vmul.f32 0.3275911, %v993_v52  ;;  %v1021_v8 = vsub.f32 0.0, %v993_v52 }
 0x6eb   :  { %v996_v63 = vmul.f32 0.3275911, %v994_v62  ;;  %v1022_v9 = vsub.f32 0.0, %v994_v62 }
 0x6ec   :  { %v997_v4 = vadd.f32 1.0, %v995_v53  ;;  %v1023_v3 = vmul.f32 %v1021_v8, %v993_v52 }
 0x6ed   :  { %v998_v6 = vadd.f32 1.0, %v996_v63  ;;  %v1024_v10 = vmul.f32 %v1022_v9, %v994_v62 }
 0x6ee   :  { %1582 = vrcp.f32 %v997_v4  ;;  %v1025_v13 = vmul.f32 1.442695, %v1023_v3 }
 0x6ef   :  { %1584 = vrcp.f32 %v998_v6  ;;  %v1027_v5 = vmul.f32 1.442695, %v1024_v10 }
 0x6f0   :  { %1586 = vpow2.f32 %v1025_v13  ;;  %v1242_v13 = vld [vmem:[%s2167_s17] ss:$0 sm:$0xff] }
 0x6f1   :  { %1588 = vpow2.f32 %v1027_v5 }
 0x6f8   :  { %v1583_v50 = vpop.eup %1582 }
 0x6f9   :  { %v1585_v44 = vpop.eup %1584  ;;  %v1003_v17 = vmul.f32 1.0614054, %v1583_v50 }
 0x6fa   :  { %v1004_v11 = vmul.f32 1.0614054, %v1585_v44  ;;  %v1587_v28 = vpop.eup %1586 }
 0x6fb   :  { %v1005_v12 = vadd.f32 -1.4531521, %v1003_v17  ;;  %v1589_v30 = vpop.eup %1588  ;;  %v1241_v17 = vld [vmem:[%s2155_s15] ss:$0 sm:$0xff] }
 0x6fc   :  { %v1006_v14 = vadd.f32 -1.4531521, %v1004_v11 }
 0x6fd   :  { %v1007_v15 = vmul.f32 %v1583_v50, %v1005_v12 }
 0x6fe   :  { %v1008_v2 = vmul.f32 %v1585_v44, %v1006_v14 }
 0x6ff   :  { %v1009_v16 = vadd.f32 1.4214138, %v1007_v15 }
 0x700   :  { %v1010_v18 = vadd.f32 1.4214138, %v1008_v2 }
 0x701   :  { %v1011_v19 = vmul.f32 %v1583_v50, %v1009_v16 }
 0x702   :  { %v1012_v20 = vmul.f32 %v1585_v44, %v1010_v18 }
 0x703   :  { %v1013_v21 = vadd.f32 -0.28449672, %v1011_v19 }
 0x704   :  { %v1014_v22 = vadd.f32 -0.28449672, %v1012_v20 }
 0x705   :  { %v1015_v7 = vmul.f32 %v1583_v50, %v1013_v21 }
 0x706   :  { %v1016_v24 = vmul.f32 %v1585_v44, %v1014_v22 }
 0x707   :  { %v1017_v33 = vadd.f32 0.2548296, %v1015_v7 }
 0x708   :  { %v1018_v25 = vadd.f32 0.2548296, %v1016_v24 }
 0x709   :  { %v1019_v26 = vmul.f32 %v1583_v50, %v1017_v33 }
 0x70a   :  { %v1020_v29 = vmul.f32 %v1585_v44, %v1018_v25 }
 0x70b   :  { %v1029_v31 = vmul.f32 %v1587_v28, %v1019_v26 }
 0x70c   :  { %v1030_v32 = vmul.f32 %v1589_v30, %v1020_v29 }
 0x70d   :  { %v1031_v54 = vsub.f32 1.0, %v1029_v31 }
 0x70e   :  { %v1032_v34 = vsub.f32 1.0, %v1030_v32 }
 0x70f   :  { %v1035_v35 = vsub.f32 0.0, %v1031_v54 }
 0x710   :  { %v1036_v48 = vsub.f32 0.0, %v1032_v34 }
 0x711   :  { %v1037_v36 = vsel %vm1033_vm9, %v1031_v54, %v1035_v35 }
 0x712   :  { %v1039_v37 = vadd.f32 1.0, %v1037_v36  ;;  %v1038_v38 = vsel %vm1034_vm10, %v1032_v34, %v1036_v48 }
 0x713   :  { %v1040_v40 = vadd.f32 1.0, %v1038_v38 }
 0x714   :  { %v1041_v43 = vmul.f32 %v1039_v37, %v989_v41 }
 0x715   :  { %v1042_v42 = vmul.f32 %v1040_v40, %v990_v39 }
 0x717   :  { %1146 = vmatprep.mubr.f32.mxu0 %v1042_v42 }
 0x718   :  { %1147 = vmatmul.mubr.f32.vlgmr.msra.gmra.mrb[6].mxu0 %v1041_v43 }
 0x7eb   :  { %v1309_v27 = vpop.f32.mrb[6].mxu0 }
 0x7ec   :  { %v1310_v1 = vpop.f32.mrb[7].mxu0 }
 0x7ed   :  { %v1311_v47 = vadd.f32 %v1310_v1, %v1309_v27 }
 0x7ef   :  { %v1149_v0 = vadd.f32 %v1311_v47, %v1240_v46 }
 0x7f1   :  { %v1153_v49 = vrot.slane %v1149_v0, 1  ;;  %v1156_v57 = vadd.f32 %v1149_v0, %v2084_v23 }
 0x7f3   :  { %v1157_v51 = vadd.f32 %v1153_v49, %v2082_v45 }
 0x7f5   :  { %v1162_v55 = vrot.slane %v1157_v51, 7 }
 0x7f7   :  { %v1163_v56 = vsel %vm333_vm1, %v1162_v55, %v1156_v57 }
 0x7f8   :  { %v1165_v58 = vsel %vm823_vm8, %v1163_v56, 0.0 }
 0x7f9   :  { %1166 = vadd.xlane.f32.xlu0 %v1165_v58 }
 0x886   :  { %v1167_v59 = vpop.xlane.xlu0 %1166 }
 0x887   :  { %v1168_v60 = vmul.f32 0.0078125, %v1167_v59 }
 0x889   :  { %v1170_v61 = vrot.slane %v1168_v60, 1  ;;  %v1173_v52 = vsub.f32 %v1156_v57, %v1168_v60 }
 0x88b   :  { %v1174_v62 = vsub.f32 %v1157_v51, %v1170_v61  ;;  %v1175_v63 = vmul.f32 %v1173_v52, %v1173_v52 }
 0x88d   :  { %v1176_v53 = vmul.f32 %v1174_v62, %v1174_v62 }
 0x88f   :  { %v1179_v4 = vrot.slane %v1176_v53, 7 }
 0x891   :  { %v1180_v6 = vsel %vm333_vm1, %v1179_v4, %v1175_v63 }
 0x892   :  { %v1182_v45 = vsel %vm823_vm8, %v1180_v6, 0.0 }
 0x893   :  { %1183 = vadd.xlane.f32.xlu1 %v1182_v45 }
 0x920   :  { %v1184_v23 = vpop.xlane.xlu1 %1183 }
 0x921   :  { %v1185_v8 = vmul.f32 0.0078125, %v1184_v23 }
 0x923   :  { %v1186_v9 = vadd.f32 1e-06, %v1185_v8 }
 0x925   :  { %1590 = vrsqrt.f32 %v1186_v9 }
 0x92f   :  { %v1591_v50 = vpop.eup %1590 }
 0x930   :  { %v1189_v3 = vrot.slane %v1591_v50, 1  ;;  %v1192_v44 = vmul.f32 %v1591_v50, %v1173_v52 }
 0x932   :  { %v1193_v10 = vmul.f32 %v1189_v3, %v1174_v62  ;;  %v1200_v11 = vmul.f32 %v1241_v17, %v1192_v44 }
 0x934   :  { %v1201_v12 = vmul.f32 %v1241_v17, %v1193_v10  ;;  %v1208_v15 = vadd.f32 %v1242_v13, %v1200_v11 }
 0x936   :  { %v1209_v14 = vadd.f32 %v1242_v13, %v1201_v12 }
 0x938   :  { %v1212_v5 = vrot.slane %v1209_v14, 7 }
 0x93a   :  { %v1213_v2 = vsel %vm333_vm1, %v1212_v5, %v1208_v15 }
 0x93b   :  { %1215 = vst [vmem:[#allocation14] sm:$0x3] %v1213_v2 }
 0x93c   :  { %1735 = shalt.err (!%p1732_p10)
}
 0x93d   :  { %s2168_s13 = sld [smem:[#allocation23_spill]] }
 0x943   :  { %s1736_s22 = scalar_lea.hbm %s2168_s13, 32 }
 0x944   :  { %p1737_p11 = scmp.ne.s32.totalorder %s2168_s13, %s1736_s22  ;;  %p1740_p12 = scmp.lt.u32.totalorder %s1736_s22, %s2168_s13 }
 0x946   :  { %p1742_p13 = pnand %p1740_p12, %p1737_p11 }
 0x948   :  { %1745 = shalt.err (!%p1742_p13)
}
 0x949   :  { %1225 = dma.vmem_to_hbm [thread:$0]  %s1223_s30, 32, %s2168_s13, [#allocation5]  }
 0x94a   :  { %1754 = dma.done.wait [#allocation5], 32  }
 0x94b   :  { %1755 = vsyncadd [#allocation5], 4294967264 }
 0x94c   :  { %1229 = vsyncpa [#allocation4], 1 }
 0x94d   :  { %1230 = vsyncpa [#allocation7], 1 }
 0x94e   :  { %1231 = vsyncpa [#allocation10], 1 }
 0x94f   :  { %1232 = vsyncpa [#allocation13], 1 }
 0x950   :  { %1233 = vsyncpa [#allocation5], 1 }

</bundles_post_ra>
